<compile_context>
chip_gen: v5e
topology: v5e:2x2
jax: 0.10.0
libtpu: 0.0.40
codegen_flags: <defaults>
</compile_context>

<pallas_src>
import functools

import jax
import jax.numpy as jnp
from jax.experimental import pallas as pl
from jax.experimental.pallas import tpu as pltpu

LANE = 128


def _round_up(n, m):
    return ((n + m - 1) // m) * m


def _pick_row_chunk(h, w, target_rows=4096):
    """Largest power-of-two divisor of h with th*w <= target_rows (min 1)."""
    limit = max(1, target_rows // max(w, 1))
    th, t = 1, 1
    while t <= h:
        if h % t == 0 and t <= limit:
            th = t
        t *= 2
    return th


# ----------------------------------------------------------------------------
# Fused kernel.  Grid = (B,): one padded image per step.
#   x_ref   : (1, Hp, Wp, Cin)   bf16  spatially padded NHWC image
#   w_ref   : (9, Cin, C_PAD)    bf16  per-tap conv weights (lane-padded C)
#   cb_ref  : (1, C_PAD)         f32   conv bias
#   hw_ref  : (C_PAD, NC_PAD)    f32   head weights
#   hb_ref  : (1, NC_PAD)        f32   head bias
#   out_ref : (1, 1, NC_PAD)     f32   logits for this batch element
# ----------------------------------------------------------------------------
def _make_kernel(Cin, W, TH, n_chunks, C_PAD, hw_total):
    inv_hw = 1.0 / float(hw_total)

    def kernel(x_ref, w_ref, cb_ref, hw_ref, hb_ref, out_ref):
        bias = cb_ref[...]                                   # [1, C_PAD]
        # Hoisted: used by every chunk (JAX does not CSE broadcasts in loops).
        ones_row = jnp.ones((1, TH * W), jnp.float32)

        def chunk_body(r, pooled):
            row0 = r * TH
            acc = jnp.zeros((TH * W, C_PAD), jnp.float32)
            # 3x3 conv as 9 shifted MXU matmuls on the VMEM-resident tile.
            for dy in range(3):
                # Aligned full-width row slab; only the (cheap) leading row
                # dim carries a dynamic offset.
                slab = x_ref[0, pl.ds(row0 + dy, TH), :, :]  # [TH, Wp, Cin]
                for dx in range(3):
                    win = slab[:, dx:dx + W, :]              # [TH, W, Cin]
                    win = win.reshape(TH * W, Cin)
                    acc = acc + jnp.dot(
                        win, w_ref[dy * 3 + dx],
                        preferred_element_type=jnp.float32)
            acc = jnp.maximum(acc + bias, 0.0)
            # Row-sum on the MXU (instead of a cross-sublane reduce).
            return pooled + jnp.dot(ones_row, acc,
                                    preferred_element_type=jnp.float32)

        pooled0 = jnp.zeros((1, C_PAD), jnp.float32)
        if n_chunks == 1:
            pooled = chunk_body(0, pooled0)
        else:
            pooled = jax.lax.fori_loop(0, n_chunks, chunk_body, pooled0)

        pooled = pooled * inv_hw                             # global avg pool
        logits = jnp.dot(pooled, hw_ref[...],
                         preferred_element_type=jnp.float32) + hb_ref[...]
        out_ref[0] = logits.astype(out_ref.dtype)

    return kernel


# ----------------------------------------------------------------------------
# Full forward pass (BaseModel.forward equivalent).  x: [B, Cin, H, W] (NCHW).
# Params: conv_w [9*Cin, C], conv_b [1, C], head_w [C, NC], head_b [1, NC].
# ----------------------------------------------------------------------------
def base_model_forward(x_nchw, params, th=None):
    conv_w, conv_b, head_w, head_b = params
    B, Cin, H, W = x_nchw.shape
    K, C = conv_w.shape
    assert K == 9 * Cin
    NC = head_w.shape[1]
    HW = H * W

    C_PAD = _round_up(C, LANE)
    NC_PAD = _round_up(NC, LANE)
    if th is None:
        th = _pick_row_chunk(H, W)
    assert H % th == 0, "row chunk must divide H"  # TODO(synk): ragged chunk
    n_chunks = H // th

    # NCHW -> NHWC, bf16 cast BEFORE padding, single fused glue pass.
    x_nhwc = jnp.transpose(x_nchw, (0, 2, 3, 1)).astype(jnp.bfloat16)
    x_pad = jnp.pad(x_nhwc, ((0, 0), (1, 1), (1, 1), (0, 0)))   # [B,Hp,Wp,Cin]
    Hp, Wp = H + 2, W + 2

    # Conv weights as 9 per-tap [Cin, C_PAD] slabs (zero lane padding of C).
    cw = jnp.zeros((K, C_PAD), jnp.float32).at[:, :C].set(conv_w)
    cw = cw.reshape(9, Cin, C_PAD).astype(jnp.bfloat16)
    cb = jnp.zeros((1, C_PAD), jnp.float32).at[:, :C].set(conv_b)
    hw_w = jnp.zeros((C_PAD, NC_PAD), jnp.float32).at[:C, :NC].set(head_w)
    hb = jnp.zeros((1, NC_PAD), jnp.float32).at[:, :NC].set(head_b)

    kernel = _make_kernel(Cin=Cin, W=W, TH=th, n_chunks=n_chunks,
                          C_PAD=C_PAD, hw_total=HW)

    out = pl.pallas_call(
        kernel,
        out_shape=jax.ShapeDtypeStruct((B, 1, NC_PAD), jnp.float32),
        grid=(B,),
        in_specs=[
            pl.BlockSpec((1, Hp, Wp, Cin), lambda b: (b, 0, 0, 0)),  # streamed
            pl.BlockSpec((9, Cin, C_PAD), lambda b: (0, 0, 0)),      # resident
            pl.BlockSpec((1, C_PAD), lambda b: (0, 0)),
            pl.BlockSpec((C_PAD, NC_PAD), lambda b: (0, 0)),
            pl.BlockSpec((1, NC_PAD), lambda b: (0, 0)),
        ],
        out_specs=pl.BlockSpec((1, 1, NC_PAD), lambda b: (b, 0, 0)),
        compiler_params=pltpu.CompilerParams(
            dimension_semantics=("parallel",),
            vmem_limit_bytes=32 * 1024 * 1024,
        ),
    )(x_pad, cw, cb, hw_w, hb)

    return out[:, 0, :NC]                                        # [B, NC]


# ----------------------------------------------------------------------------
# Pure-JAX f32 reference (uses im2col only for checking) and parameter init.
# ----------------------------------------------------------------------------
def _im2col_3x3(x_nhwc):
    B, H, W, Cin = x_nhwc.shape
    xp = jnp.pad(x_nhwc, ((0, 0), (1, 1), (1, 1), (0, 0)))
    cols = [xp[:, dy:dy + H, dx:dx + W, :]
            for dy in range(3) for dx in range(3)]
    patches = jnp.concatenate(cols, axis=-1)                    # [B,H,W,9*Cin]
    return patches.reshape(B, H * W, 9 * Cin)


def reference_forward(x_nchw, params):
    conv_w, conv_b, head_w, head_b = params
    x_nhwc = jnp.transpose(x_nchw, (0, 2, 3, 1)).astype(jnp.float32)
    patches = _im2col_3x3(x_nhwc)                               # [B, HW, K]
    feat = jnp.maximum(jnp.einsum("bmk,kc->bmc", patches, conv_w) + conv_b, 0.0)
    pooled = feat.mean(axis=1)                                  # [B, C]
    return pooled @ head_w + head_b


def init_params(key, in_chans, hidden_c, num_classes):
    k1, k2, k3, k4 = jax.random.split(key, 4)
    conv_w = jax.random.normal(k1, (9 * in_chans, hidden_c), jnp.float32) * 0.1
    conv_b = jax.random.normal(k2, (1, hidden_c), jnp.float32) * 0.01
    head_w = jax.random.normal(k3, (hidden_c, num_classes), jnp.float32) * 0.1
    head_b = jax.random.normal(k4, (1, num_classes), jnp.float32) * 0.01
    return conv_w, conv_b, head_w, head_b


if __name__ == "__main__":
    B, Cin, H, W = 2, 4, 16, 16
    hidden_c, num_classes = 32, 8

    key = jax.random.PRNGKey(0)
    kx, kp = jax.random.split(key)
    x = jax.random.normal(kx, (B, Cin, H, W), jnp.float32)
    params = init_params(kp, Cin, hidden_c, num_classes)

    # th=8 exercises the multi-chunk in-kernel reduction path at this small
    # test shape; at realistic sizes the default picks up to 4096-row chunks.
    fwd = jax.jit(functools.partial(base_model_forward, th=8))
    logits = fwd(x, params)
    jax.block_until_ready(logits)
    assert logits.shape == (B, num_classes)

    # Loose sanity check vs. pure-JAX f32 reference (kernel uses bf16 inputs).
    ref = reference_forward(x, params)
    err = float(jnp.max(jnp.abs(logits - ref)))
    assert err < 5e-2, f"max abs error too large: {err}"

    print("KERNEL_OK")
</pallas_src>

<mosaic_0001>
module attributes {stable_mosaic.version = 11 : i64} {
  func.func @kernel(%arg0: i32, %arg1: memref<1x18x18x4xbf16, #tpu.memory_space<vmem>>, %arg2: memref<9x4x128xbf16, #tpu.memory_space<vmem>>, %arg3: memref<1x128xf32, #tpu.memory_space<vmem>>, %arg4: memref<128x128xf32, #tpu.memory_space<vmem>>, %arg5: memref<1x128xf32, #tpu.memory_space<vmem>>, %arg6: memref<1x1x128xf32, #tpu.memory_space<vmem>>) attributes {dimension_semantics = [#tpu.dimension_semantics<parallel>], iteration_bounds = array<i64: 2>, scalar_prefetch = 0 : i64, scratch_operands = 0 : i64, tpu.core_type = #tpu.core_type<tc>, window_params = [{transform_indices = @transform_0, window_bounds = array<i64: 1, 18, 18, 4>}, {pipeline_mode = #tpu.pipeline_mode<synchronous>, transform_indices = @transform_1, window_bounds = array<i64: 9, 4, 128>}, {pipeline_mode = #tpu.pipeline_mode<synchronous>, transform_indices = @transform_2, window_bounds = array<i64: 1, 128>}, {pipeline_mode = #tpu.pipeline_mode<synchronous>, transform_indices = @transform_3, window_bounds = array<i64: 128, 128>}, {pipeline_mode = #tpu.pipeline_mode<synchronous>, transform_indices = @transform_4, window_bounds = array<i64: 1, 128>}, {transform_indices = @transform_5, window_bounds = array<i64: 1, 1, 128>}]} {
    %c0 = arith.constant 0 : index
    %c0_0 = arith.constant 0 : index
    %0 = vector.load %arg3[%c0, %c0_0] : memref<1x128xf32, #tpu.memory_space<vmem>>, vector<1x128xf32>
    %cst = arith.constant 1.000000e+00 : f32
    %1 = vector.broadcast %cst : f32 to vector<1x128xf32>
    %cst_1 = arith.constant 0.000000e+00 : f32
    %2 = vector.broadcast %cst_1 : f32 to vector<1x128xf32>
    %c0_i32 = arith.constant 0 : i32
    %c2_i32 = arith.constant 2 : i32
    %3 = arith.addi %c0_i32, %c2_i32 : i32
    %c1_i32 = arith.constant 1 : i32
    %4 = scf.for %arg7 = %c0_i32 to %3 step %c1_i32 iter_args(%arg8 = %2) -> (vector<1x128xf32>)  : i32 {
      %c8_i32 = arith.constant 8 : i32
      %14 = arith.muli %arg7, %c8_i32 : i32
      %cst_12 = arith.constant 0.000000e+00 : f32
      %15 = vector.broadcast %cst_12 : f32 to vector<128x128xf32>
      %c0_i32_13 = arith.constant 0 : i32
      %16 = arith.addi %14, %c0_i32_13 : i32
      %c0_14 = arith.constant 0 : index
      %17 = arith.index_cast %16 : i32 to index
      %c0_15 = arith.constant 0 : index
      %c0_16 = arith.constant 0 : index
      %18 = vector.load %arg1[%c0_14, %17, %c0_15, %c0_16] : memref<1x18x18x4xbf16, #tpu.memory_space<vmem>>, vector<1x8x18x4xbf16>
      %19 = vector.shape_cast %18 : vector<1x8x18x4xbf16> to vector<8x18x4xbf16>
      %20 = vector.extract_strided_slice %19 {offsets = [0, 0, 0], sizes = [8, 16, 4], strides = [1, 1, 1]} : vector<8x18x4xbf16> to vector<8x16x4xbf16>
      %21 = vector.shape_cast %20 : vector<8x16x4xbf16> to vector<128x4xbf16>
      %c0_17 = arith.constant 0 : index
      %c0_18 = arith.constant 0 : index
      %c0_19 = arith.constant 0 : index
      %22 = vector.load %arg2[%c0_17, %c0_18, %c0_19] : memref<9x4x128xbf16, #tpu.memory_space<vmem>>, vector<1x4x128xbf16>
      %23 = vector.shape_cast %22 : vector<1x4x128xbf16> to vector<4x128xbf16>
      %cst_20 = arith.constant dense<0.000000e+00> : vector<128x128xf32>
      %24 = tpu.matmul %21, %23, %cst_20 {dimension_numbers = #tpu.dot_dimension_numbers<[1], [0], [0], [1], [0, 0, 1, 1], [], []>} : vector<128x4xbf16>, vector<4x128xbf16>, vector<128x128xf32> -> vector<128x128xf32>
      %25 = arith.addf %15, %24 : vector<128x128xf32>
      %26 = vector.extract_strided_slice %19 {offsets = [0, 1, 0], sizes = [8, 16, 4], strides = [1, 1, 1]} : vector<8x18x4xbf16> to vector<8x16x4xbf16>
      %27 = vector.shape_cast %26 : vector<8x16x4xbf16> to vector<128x4xbf16>
      %c1 = arith.constant 1 : index
      %c0_21 = arith.constant 0 : index
      %c0_22 = arith.constant 0 : index
      %28 = vector.load %arg2[%c1, %c0_21, %c0_22] : memref<9x4x128xbf16, #tpu.memory_space<vmem>>, vector<1x4x128xbf16>
      %29 = vector.shape_cast %28 : vector<1x4x128xbf16> to vector<4x128xbf16>
      %cst_23 = arith.constant dense<0.000000e+00> : vector<128x128xf32>
      %30 = tpu.matmul %27, %29, %cst_23 {dimension_numbers = #tpu.dot_dimension_numbers<[1], [0], [0], [1], [0, 0, 1, 1], [], []>} : vector<128x4xbf16>, vector<4x128xbf16>, vector<128x128xf32> -> vector<128x128xf32>
      %31 = arith.addf %25, %30 : vector<128x128xf32>
      %32 = vector.extract_strided_slice %19 {offsets = [0, 2, 0], sizes = [8, 16, 4], strides = [1, 1, 1]} : vector<8x18x4xbf16> to vector<8x16x4xbf16>
      %33 = vector.shape_cast %32 : vector<8x16x4xbf16> to vector<128x4xbf16>
      %c2 = arith.constant 2 : index
      %c0_24 = arith.constant 0 : index
      %c0_25 = arith.constant 0 : index
      %34 = vector.load %arg2[%c2, %c0_24, %c0_25] : memref<9x4x128xbf16, #tpu.memory_space<vmem>>, vector<1x4x128xbf16>
      %35 = vector.shape_cast %34 : vector<1x4x128xbf16> to vector<4x128xbf16>
      %cst_26 = arith.constant dense<0.000000e+00> : vector<128x128xf32>
      %36 = tpu.matmul %33, %35, %cst_26 {dimension_numbers = #tpu.dot_dimension_numbers<[1], [0], [0], [1], [0, 0, 1, 1], [], []>} : vector<128x4xbf16>, vector<4x128xbf16>, vector<128x128xf32> -> vector<128x128xf32>
      %37 = arith.addf %31, %36 : vector<128x128xf32>
      %c1_i32_27 = arith.constant 1 : i32
      %38 = arith.addi %14, %c1_i32_27 : i32
      %c0_28 = arith.constant 0 : index
      %39 = arith.index_cast %38 : i32 to index
      %c0_29 = arith.constant 0 : index
      %c0_30 = arith.constant 0 : index
      %40 = vector.load %arg1[%c0_28, %39, %c0_29, %c0_30] : memref<1x18x18x4xbf16, #tpu.memory_space<vmem>>, vector<1x8x18x4xbf16>
      %41 = vector.shape_cast %40 : vector<1x8x18x4xbf16> to vector<8x18x4xbf16>
      %42 = vector.extract_strided_slice %41 {offsets = [0, 0, 0], sizes = [8, 16, 4], strides = [1, 1, 1]} : vector<8x18x4xbf16> to vector<8x16x4xbf16>
      %43 = vector.shape_cast %42 : vector<8x16x4xbf16> to vector<128x4xbf16>
      %c3 = arith.constant 3 : index
      %c0_31 = arith.constant 0 : index
      %c0_32 = arith.constant 0 : index
      %44 = vector.load %arg2[%c3, %c0_31, %c0_32] : memref<9x4x128xbf16, #tpu.memory_space<vmem>>, vector<1x4x128xbf16>
      %45 = vector.shape_cast %44 : vector<1x4x128xbf16> to vector<4x128xbf16>
      %cst_33 = arith.constant dense<0.000000e+00> : vector<128x128xf32>
      %46 = tpu.matmul %43, %45, %cst_33 {dimension_numbers = #tpu.dot_dimension_numbers<[1], [0], [0], [1], [0, 0, 1, 1], [], []>} : vector<128x4xbf16>, vector<4x128xbf16>, vector<128x128xf32> -> vector<128x128xf32>
      %47 = arith.addf %37, %46 : vector<128x128xf32>
      %48 = vector.extract_strided_slice %41 {offsets = [0, 1, 0], sizes = [8, 16, 4], strides = [1, 1, 1]} : vector<8x18x4xbf16> to vector<8x16x4xbf16>
      %49 = vector.shape_cast %48 : vector<8x16x4xbf16> to vector<128x4xbf16>
      %c4 = arith.constant 4 : index
      %c0_34 = arith.constant 0 : index
      %c0_35 = arith.constant 0 : index
      %50 = vector.load %arg2[%c4, %c0_34, %c0_35] : memref<9x4x128xbf16, #tpu.memory_space<vmem>>, vector<1x4x128xbf16>
      %51 = vector.shape_cast %50 : vector<1x4x128xbf16> to vector<4x128xbf16>
      %cst_36 = arith.constant dense<0.000000e+00> : vector<128x128xf32>
      %52 = tpu.matmul %49, %51, %cst_36 {dimension_numbers = #tpu.dot_dimension_numbers<[1], [0], [0], [1], [0, 0, 1, 1], [], []>} : vector<128x4xbf16>, vector<4x128xbf16>, vector<128x128xf32> -> vector<128x128xf32>
      %53 = arith.addf %47, %52 : vector<128x128xf32>
      %54 = vector.extract_strided_slice %41 {offsets = [0, 2, 0], sizes = [8, 16, 4], strides = [1, 1, 1]} : vector<8x18x4xbf16> to vector<8x16x4xbf16>
      %55 = vector.shape_cast %54 : vector<8x16x4xbf16> to vector<128x4xbf16>
      %c5 = arith.constant 5 : index
      %c0_37 = arith.constant 0 : index
      %c0_38 = arith.constant 0 : index
      %56 = vector.load %arg2[%c5, %c0_37, %c0_38] : memref<9x4x128xbf16, #tpu.memory_space<vmem>>, vector<1x4x128xbf16>
      %57 = vector.shape_cast %56 : vector<1x4x128xbf16> to vector<4x128xbf16>
      %cst_39 = arith.constant dense<0.000000e+00> : vector<128x128xf32>
      %58 = tpu.matmul %55, %57, %cst_39 {dimension_numbers = #tpu.dot_dimension_numbers<[1], [0], [0], [1], [0, 0, 1, 1], [], []>} : vector<128x4xbf16>, vector<4x128xbf16>, vector<128x128xf32> -> vector<128x128xf32>
      %59 = arith.addf %53, %58 : vector<128x128xf32>
      %c2_i32_40 = arith.constant 2 : i32
      %60 = arith.addi %14, %c2_i32_40 : i32
      %c0_41 = arith.constant 0 : index
      %61 = arith.index_cast %60 : i32 to index
      %c0_42 = arith.constant 0 : index
      %c0_43 = arith.constant 0 : index
      %62 = vector.load %arg1[%c0_41, %61, %c0_42, %c0_43] : memref<1x18x18x4xbf16, #tpu.memory_space<vmem>>, vector<1x8x18x4xbf16>
      %63 = vector.shape_cast %62 : vector<1x8x18x4xbf16> to vector<8x18x4xbf16>
      %64 = vector.extract_strided_slice %63 {offsets = [0, 0, 0], sizes = [8, 16, 4], strides = [1, 1, 1]} : vector<8x18x4xbf16> to vector<8x16x4xbf16>
      %65 = vector.shape_cast %64 : vector<8x16x4xbf16> to vector<128x4xbf16>
      %c6 = arith.constant 6 : index
      %c0_44 = arith.constant 0 : index
      %c0_45 = arith.constant 0 : index
      %66 = vector.load %arg2[%c6, %c0_44, %c0_45] : memref<9x4x128xbf16, #tpu.memory_space<vmem>>, vector<1x4x128xbf16>
      %67 = vector.shape_cast %66 : vector<1x4x128xbf16> to vector<4x128xbf16>
      %cst_46 = arith.constant dense<0.000000e+00> : vector<128x128xf32>
      %68 = tpu.matmul %65, %67, %cst_46 {dimension_numbers = #tpu.dot_dimension_numbers<[1], [0], [0], [1], [0, 0, 1, 1], [], []>} : vector<128x4xbf16>, vector<4x128xbf16>, vector<128x128xf32> -> vector<128x128xf32>
      %69 = arith.addf %59, %68 : vector<128x128xf32>
      %70 = vector.extract_strided_slice %63 {offsets = [0, 1, 0], sizes = [8, 16, 4], strides = [1, 1, 1]} : vector<8x18x4xbf16> to vector<8x16x4xbf16>
      %71 = vector.shape_cast %70 : vector<8x16x4xbf16> to vector<128x4xbf16>
      %c7 = arith.constant 7 : index
      %c0_47 = arith.constant 0 : index
      %c0_48 = arith.constant 0 : index
      %72 = vector.load %arg2[%c7, %c0_47, %c0_48] : memref<9x4x128xbf16, #tpu.memory_space<vmem>>, vector<1x4x128xbf16>
      %73 = vector.shape_cast %72 : vector<1x4x128xbf16> to vector<4x128xbf16>
      %cst_49 = arith.constant dense<0.000000e+00> : vector<128x128xf32>
      %74 = tpu.matmul %71, %73, %cst_49 {dimension_numbers = #tpu.dot_dimension_numbers<[1], [0], [0], [1], [0, 0, 1, 1], [], []>} : vector<128x4xbf16>, vector<4x128xbf16>, vector<128x128xf32> -> vector<128x128xf32>
      %75 = arith.addf %69, %74 : vector<128x128xf32>
      %76 = vector.extract_strided_slice %63 {offsets = [0, 2, 0], sizes = [8, 16, 4], strides = [1, 1, 1]} : vector<8x18x4xbf16> to vector<8x16x4xbf16>
      %77 = vector.shape_cast %76 : vector<8x16x4xbf16> to vector<128x4xbf16>
      %c8 = arith.constant 8 : index
      %c0_50 = arith.constant 0 : index
      %c0_51 = arith.constant 0 : index
      %78 = vector.load %arg2[%c8, %c0_50, %c0_51] : memref<9x4x128xbf16, #tpu.memory_space<vmem>>, vector<1x4x128xbf16>
      %79 = vector.shape_cast %78 : vector<1x4x128xbf16> to vector<4x128xbf16>
      %cst_52 = arith.constant dense<0.000000e+00> : vector<128x128xf32>
      %80 = tpu.matmul %77, %79, %cst_52 {dimension_numbers = #tpu.dot_dimension_numbers<[1], [0], [0], [1], [0, 0, 1, 1], [], []>} : vector<128x4xbf16>, vector<4x128xbf16>, vector<128x128xf32> -> vector<128x128xf32>
      %81 = arith.addf %75, %80 : vector<128x128xf32>
      %82 = vector.broadcast %0 : vector<1x128xf32> to vector<128x128xf32>
      %83 = arith.addf %81, %82 : vector<128x128xf32>
      %cst_53 = arith.constant 0.000000e+00 : f32
      %84 = vector.broadcast %cst_53 : f32 to vector<128x128xf32>
      %85 = arith.maximumf %83, %84 : vector<128x128xf32>
      %cst_54 = arith.constant dense<0.000000e+00> : vector<1x128xf32>
      %86 = tpu.matmul %1, %85, %cst_54 {dimension_numbers = #tpu.dot_dimension_numbers<[1], [0], [0], [1], [0, 0, 1, 1], [], []>} : vector<1x128xf32>, vector<128x128xf32>, vector<1x128xf32> -> vector<1x128xf32>
      %87 = arith.addf %arg8, %86 : vector<1x128xf32>
      scf.yield %87 : vector<1x128xf32>
    }
    %c2_i32_2 = arith.constant 2 : i32
    %cst_3 = arith.constant 3.906250e-03 : f32
    %5 = vector.broadcast %cst_3 : f32 to vector<1x128xf32>
    %6 = arith.mulf %4, %5 : vector<1x128xf32>
    %c0_4 = arith.constant 0 : index
    %c0_5 = arith.constant 0 : index
    %7 = vector.load %arg4[%c0_4, %c0_5] : memref<128x128xf32, #tpu.memory_space<vmem>>, vector<128x128xf32>
    %cst_6 = arith.constant dense<0.000000e+00> : vector<1x128xf32>
    %8 = tpu.matmul %6, %7, %cst_6 {dimension_numbers = #tpu.dot_dimension_numbers<[1], [0], [0], [1], [0, 0, 1, 1], [], []>} : vector<1x128xf32>, vector<128x128xf32>, vector<1x128xf32> -> vector<1x128xf32>
    %c0_7 = arith.constant 0 : index
    %c0_8 = arith.constant 0 : index
    %9 = vector.load %arg5[%c0_7, %c0_8] : memref<1x128xf32, #tpu.memory_space<vmem>>, vector<1x128xf32>
    %10 = arith.addf %8, %9 : vector<1x128xf32>
    %c0_9 = arith.constant 0 : index
    %c0_10 = arith.constant 0 : index
    %c0_11 = arith.constant 0 : index
    %11 = vector.load %arg6[%c0_9, %c0_10, %c0_11] : memref<1x1x128xf32, #tpu.memory_space<vmem>>, vector<1x1x128xf32>
    %12 = vector.shape_cast %11 : vector<1x1x128xf32> to vector<1x128xf32>
    %13 = vector.shape_cast %10 : vector<1x128xf32> to vector<1x1x128xf32>
    tpu.vector_store %arg6[%c0_9, %c0_10, %c0_11], %13 {strides = array<i32>} : memref<1x1x128xf32, #tpu.memory_space<vmem>>, vector<1x1x128xf32>,
    return
  }
  func.func @transform_0(%arg0: i32) -> (i32, i32, i32, i32) {
    %c0_i32 = arith.constant 0 : i32
    %c0_i32_0 = arith.constant 0 : i32
    %c0_i32_1 = arith.constant 0 : i32
    %c0_i32_2 = arith.constant 0 : i32
    return %arg0, %c0_i32, %c0_i32_0, %c0_i32_1 : i32, i32, i32, i32
  }
  func.func @transform_1(%arg0: i32) -> (i32, i32, i32) {
    %c0_i32 = arith.constant 0 : i32
    %c0_i32_0 = arith.constant 0 : i32
    %c0_i32_1 = arith.constant 0 : i32
    %c0_i32_2 = arith.constant 0 : i32
    return %c0_i32, %c0_i32_0, %c0_i32_1 : i32, i32, i32
  }
  func.func @transform_2(%arg0: i32) -> (i32, i32) {
    %c0_i32 = arith.constant 0 : i32
    %c0_i32_0 = arith.constant 0 : i32
    %c0_i32_1 = arith.constant 0 : i32
    return %c0_i32, %c0_i32_0 : i32, i32
  }
  func.func @transform_3(%arg0: i32) -> (i32, i32) {
    %c0_i32 = arith.constant 0 : i32
    %c0_i32_0 = arith.constant 0 : i32
    %c0_i32_1 = arith.constant 0 : i32
    return %c0_i32, %c0_i32_0 : i32, i32
  }
  func.func @transform_4(%arg0: i32) -> (i32, i32) {
    %c0_i32 = arith.constant 0 : i32
    %c0_i32_0 = arith.constant 0 : i32
    %c0_i32_1 = arith.constant 0 : i32
    return %c0_i32, %c0_i32_0 : i32, i32
  }
  func.func @transform_5(%arg0: i32) -> (i32, i32, i32) {
    %c0_i32 = arith.constant 0 : i32
    %c0_i32_0 = arith.constant 0 : i32
    %c0_i32_1 = arith.constant 0 : i32
    return %arg0, %c0_i32, %c0_i32_0 : i32, i32, i32
  }
}

</mosaic_0001>

<bundles_post_ra>
// kernel: base_model_forward.1
= control target key start
LH: loop header
LB: loop body
LE: loop exit
PB: predicated region body
PF: predicated region fallthrough
CT: control target
= control target key end

     0   :  { %10 = vsyncpa [#allocation3], 0  ;;  %s3879_s0 = inlined_call_operand.vmem [shape: bf16[2,18,18,4], index: 0, kind: input, shape index: {}]   ;;  %s3880_s1 = inlined_call_operand.vmem [shape: bf16[9,4,128], index: 1, kind: input, shape index: {}]   ;;  %s3881_s2 = inlined_call_operand.vmem [shape: f32[1,128], index: 2, kind: input, shape index: {}]   ;;  %s3882_s3 = inlined_call_operand.vmem [shape: f32[128,128], index: 3, kind: input, shape index: {}]   ;;  %s3883_s4 = inlined_call_operand.vmem [shape: f32[1,128], index: 4, kind: input, shape index: {}]   ;;  %s3884_s5 = inlined_call_operand.hbm [shape: f32[2,1,128], index: 5, kind: output, shape index: {}]  }
   0x1   :  { %12 = vsyncpa [#allocation3 + $0x1], 0  ;;  %s2807_s18 = smov 0   ;;  %s2809_s19 = smov 0  }
   0x2   :  { %s2811_s20 = smov 0   ;;  %s2813_s21 = smov 0  }
   0x3 LB: > { %s2828_s22 = sadd.s32 4294967295, %s2766_s21   ;;  %s2349_s23 = sadd.s32 4294967294, %s2766_s21   ;;  %s2766_s21 = sphi %s2813_s21, %s3899_s21   ;;  %s2762_s20 = sphi %s2811_s20, %s3898_s20   ;;  %s2758_s19 = sphi %s2809_s19, %s3897_s19   ;;  %s2754_s18 = sphi %s2807_s18, %s3896_s18  }
   0x4   : > { %s2832_s24 = sadd.s32 1, %s2766_s21   ;;  %s135_s25 = sadd.s32 1, %s2762_s20 }
   0x5   : > { %s132_s26 = ssub.s32 %s2766_s21, %s2832_s24  ;;  %p145_p0 = scmp.ne.s32.totalorder %s2762_s20, %s2758_s19 }
   0x6   : > { %p133_p1 = scmp.eq.s32.totalorder %s132_s26, 0  ;;  %p146_p2 = scmp.eq.s32.totalorder %s2828_s22, 1 }
   0x7   : > { %p151_p3 = scmp.ne.s32.totalorder %s2758_s19, %s2754_s18  ;;  %p152_p4 = scmp.eq.s32.totalorder %s2349_s23, 1 }
   0x8   : > { %s2843_s27 = scalar_select %p133_p1, %s2762_s20, %s135_s25  }
   0x9   : > { %p2845_p5 = por %p146_p2, %p145_p0  ;;  %p2849_p6 = por %p152_p4, %p151_p3 }
   0xa   : > { %p2352_p7 = scmp.ge.s32.totalorder %s2766_s21, 1  ;;  %p190_p8 = scmp.lt.s32.totalorder %s2766_s21, 3 }
   0xc   : > { %p191_p9 = pnand %p2352_p7, %p190_p8 }
   0xe   : > { %194 = sbr.rel (%p191_p9) target bundleno = 777 (0x309), region = 40 }
  0x13   : > { %s215_s30 = sand.u32 1, %s2758_s19   ;;  %p217_p10 = scmp.lt.s32.totalorder %s2828_s22, 1  ;;  %v2860_v0 = vld [vmem:[%s3881_s2] sm:$0x1]  ;;  %v2872_v1 = vmov 0.0  }
  0x14   : > { %3887 = vst [vmem:[#allocation5_spill] sm:$0xff] %v2860_v0  ;;  %s2870_s13 = scalar_lea.vmem [#allocation2], %s215_s30  ;;  %s2874_s14 = smov 0  }
  0x15   : > { %s218_s8 = scalar_select %p217_p10, %s2828_s22, 1 }
  0x17   : > { %s2639_s9 = smul.u32 216, %s218_s8 }
  0x19   : > { %s2866_s12 = scalar_lea.vmem %s3879_s0, %s2639_s9 }
  0x1a LB: >> { %3888 = vst [vmem:[#allocation6_spill] sm:$0xff] %v2770_v1  ;;  %v2357_v2 = vld [vmem:[%s3880_s1 + $0x2] sm:$0x3]  ;;  %vm506_vm0 = vcmask 1041408   ;;  %s2611_s17 = smul.u32 96, %s2774_s14  ;;  %vm481_vm3 = vcmask 31744   ;;  %s2774_s14 = sphi %s2874_s14, %s229_s14   ;;  %v2770_v1 = vphi %v2872_v1, %v3895_v1  }
  0x1b   : >> { %v508_v3 = vsel %vm506_vm0, %v2357_v2, 0  ;;  %vm260_vm1 = vsmask.f32 3328  ;;  %vm261_vm2 = vsmask.f32 7440  ;;  %vm683_vm5 = vcmask 1042432  }
  0x1c   : >> { %2636 = vmatpush.bf16.msra.mxu1 %v508_v3  ;;  %2637 = vmatpush.bf16.msra.mxu2 %v508_v3  ;;  %s2888_s23 = scalar_lea.vmem %s2866_s12, %s2611_s17  ;;  %vm2926_vm4 = vmor %vm260_vm1, %vm261_vm2  ;;  %vm684_vm6 = vcmask 1046532   ;;  %s229_s14 = sadd.s32 1, %s2774_s14  }
  0x1d   : >> { %2638 = vmatpush.bf16.msra.mxu3 %v508_v3  ;;  %517 = vmatpush.bf16.msra.mxu0 %v508_v3  ;;  %v2891_v4 = vld [vmem:[%s2888_s23 + $0xc] sm:$0xf]  ;;  %v2894_v5 = vld [vmem:[%s2888_s23 + $0x10] sm:$0xf]  ;;  %v2897_v6 = vld [vmem:[%s2888_s23 + $0x14] sm:$0x1] }
  0x1e   : >> { %v288_v7 = vshrl.u32 %v2891_v4, 16  ;;  %v291_v8 = vshll.u32 %v2891_v4, 16  ;;  %v297_v9 = vshll.u32 %v2894_v5, 16  ;;  %v301_v10 = vshrl.u32 %v2894_v5, 16  ;;  %v2904_v11 = vld [vmem:[%s2888_s23 + $0x24] sm:$0xf]  ;;  %vm3083_vm7 = vmor %vm683_vm5, %vm684_vm6 }
  0x1f   : >> { %v307_v12 = vshll.u32 %v2897_v6, 16  ;;  %v2908_v13 = vld [vmem:[%s2888_s23 + $0x28] sm:$0xf]  ;;  %v2911_v14 = vld [vmem:[%s2888_s23 + $0x2c] sm:$0x1]  ;;  %v336_v15 = vshrl.u32 %v2904_v11, 16 }
  0x20   : >> { %v290_v16 = vrot.slane %v288_v7, 4  ;;  %v293_v17 = vrot.slane %v291_v8, 5  ;;  %v299_v18 = vrot.slane %v297_v9, 5  ;;  %v303_v19 = vrot.slane %v301_v10, 4  ;;  %v2915_v20 = vld [vmem:[%s2888_s23 + $0x48] sm:$0xf] }
  0x21   : >> { %v309_v21 = vrot.slane %v307_v12, 5  ;;  %v338_v22 = vrot.slane %v336_v15, 4  ;;  %v339_v23 = vshll.u32 %v2904_v11, 16  ;;  %v345_v24 = vshll.u32 %v2908_v13, 16  ;;  %v2922_v29 = vld [vmem:[%s2888_s23 + $0x4c] sm:$0xf] }
  0x22   : >> { %v294_v25 = vor.u32 %v293_v17, %v290_v16  ;;  %v304_v26 = vor.u32 %v303_v19, %v299_v18  ;;  %v349_v27 = vshrl.u32 %v2908_v13, 16  ;;  %v355_v28 = vshll.u32 %v2911_v14, 16  ;;  %v2933_v40 = vld [vmem:[%s2888_s23 + $0x50] sm:$0x1]  ;;  %v2942_v48 = vld [vmem:[%s2888_s23 + $0x18] sm:$0xf] }
  0x23   : >> { %v341_v31 = vrot.slane %v339_v23, 5  ;;  %v347_v32 = vrot.slane %v345_v24, 5  ;;  %v408_v33 = vshrl.u32 %v2915_v20, 16  ;;  %v411_v34 = vshll.u32 %v2915_v20, 16  ;;  %v2948_v60 = vld [vmem:[%s2888_s23 + $0x1c] sm:$0xf] }
  0x24   : >> { %v295_v35 = vrot.slane %v294_v25, 4  ;;  %v305_v36 = vrot.slane %v304_v26, 4  ;;  %v351_v37 = vrot.slane %v349_v27, 4  ;;  %v357_v38 = vrot.slane %v355_v28, 5  ;;  %v2954_v7 = vld [vmem:[%s2888_s23 + $0x20] sm:$0x1] }
  0x25   : >> { %v342_v39 = vor.u32 %v341_v31, %v338_v22  ;;  %v410_v41 = vrot.slane %v408_v33, 4  ;;  %v413_v42 = vrot.slane %v411_v34, 5  ;;  %v417_v43 = vshll.u32 %v2922_v29, 16  ;;  %v2957_v8 = vld [vmem:[%s2888_s23 + $0x30] sm:$0xf]  ;;  %p226_p11 = scmp.ge.s32.totalorder %s229_s14, 2  }
  0x26   : >> { %v300_v44 = vsel %vm2926_vm4, %v295_v35, %v299_v18  ;;  %v310_v45 = vsel %vm2926_vm4, %v305_v36, %v309_v21  ;;  %v352_v46 = vor.u32 %v351_v37, %v347_v32  ;;  %v421_v47 = vshrl.u32 %v2922_v29, 16  ;;  %v2966_v21 = vld [vmem:[%s2888_s23 + $0x34] sm:$0xf]  ;;  %v2970_v25 = vld [vmem:[%s2888_s23 + $0x38] sm:$0x1]  ;;  %s2272_s17 = scalar_lea.hbm (%p226_p11), %s3884_s5, %s2828_s22  ;;  %s2274_s12 = sshll.u32 (%p226_p11), %s2870_s13, 4  ;;  %s2275_s12 = int_to_ptr.vmem [resolvable:$true] %s2274_s12 }
  0x27   : >> { %v459_v49 = vunpack.c.l.b16 %v300_v44  ;;  %v460_v50 = vunpack.c.l.b16 %v310_v45  ;;  %v343_v51 = vrot.slane %v342_v39, 4  ;;  %v414_v52 = vor.u32 %v413_v42, %v410_v41  ;;  %v2977_v33 = vld [vmem:[%s2888_s23 + $0x54] sm:$0xf]  ;;  %s2276_s26 = sshll.u32 (%p226_p11), %s2272_s17, 4  ;;  %s2264_s6 = scalar_lea.sflag (%p226_p11), [#allocation3], %s215_s30  ;;  %s2277_s26 = int_to_ptr.hbm [resolvable:$true] %s2276_s26 }
  0x28   : >> { %v353_v53 = vrot.slane %v352_v46, 4  ;;  %v419_v54 = vrot.slane %v417_v43, 5  ;;  %v423_v55 = vrot.slane %v421_v47, 4  ;;  %v427_v56 = vshll.u32 %v2933_v40, 16  ;;  %v2984_v46 = vld [vmem:[%s2888_s23 + $0x58] sm:$0xf] }
  0x29   : >> { %v474_v57 = vpack.c.b16 %v460_v50, %v459_v49  ;;  %v348_v58 = vsel %vm2926_vm4, %v343_v51, %v347_v32  ;;  %v415_v59 = vrot.slane %v414_v52, 4  ;;  %v312_v61 = vshrl.u32 %v2942_v48, 16  ;;  %s2710_s7 = sshra.s32 (%p226_p11), %s2277_s26, 4  ;;  %s2716_s9 = scalar_lea.hbm (%p226_p11), %s3884_s5, 2  ;;  %s2711_s7 = int_to_ptr.hbm [resolvable:$true] %s2710_s7 }
  0x2a   : >> { %v358_v62 = vsel %vm2926_vm4, %v353_v53, %v357_v38  ;;  %v463_v63 = vunpack.c.l.b16 %v348_v58  ;;  %v424_v2 = vor.u32 %v423_v55, %v419_v54  ;;  %v429_v3 = vrot.slane %v427_v56, 5  ;;  %v2988_v53 = vld [vmem:[%s2888_s23 + $0x5c] sm:$0x1]  ;;  %v259_v58 = vld [vmem:[%s3880_s1] sm:$0x3]  ;;  %s2712_s8 = scalar_lea.hbm (%p226_p11), %s2711_s7, 1  ;;  %p2717_p1 = scmp.lt.s32.totalorder (%p226_p11), %s2711_s7, %s3884_s5 }
  0x2b   : >> { %2359 = vmatmul.msk.bf16.vlgmr.msra.gmra.mxu1 %vm481_vm3, %v474_v57  ;;  %v464_v9 = vunpack.c.l.b16 %v358_v62  ;;  %v420_v10 = vsel %vm2926_vm4, %v415_v59, %v419_v54  ;;  %v314_v12 = vrot.slane %v312_v61, 4  ;;  %v315_v15 = vshll.u32 %v2942_v48, 16  ;;  %p2713_p12 = scmp.ne.s32.totalorder (%p226_p11), %s2711_s7, %s2712_s8  ;;  %p2718_p2 = scmp.lt.s32.totalorder (%p226_p11), %s2716_s9, %s2712_s8 }
  0x2c   : >> { %v425_v16 = vrot.slane %v424_v2, 4  ;;  %v469_v17 = vunpack.c.l.b16 %v420_v10  ;;  %v321_v18 = vshll.u32 %v2948_v60, 16  ;;  %v325_v19 = vshrl.u32 %v2948_v60, 16 }
  0x2d   : >> { %v476_v22 = vpack.c.b16 %v464_v9, %v463_v63  ;;  %v317_v23 = vrot.slane %v315_v15, 5  ;;  %v331_v24 = vshll.u32 %v2954_v7, 16  ;;  %v360_v26 = vshrl.u32 %v2957_v8, 16  ;;  %p2714_p13 = pnand (%p226_p11), %p2713_p12, %p2845_p5  ;;  %p2719_p3 = por (%p226_p11), %p2718_p2, %p2717_p1 }
  0x2e   : >> { %v430_v27 = vsel %vm2926_vm4, %v425_v16, %v429_v3  ;;  %v323_v28 = vrot.slane %v321_v18, 5  ;;  %v327_v31 = vrot.slane %v325_v19, 4  ;;  %v363_v32 = vshll.u32 %v2957_v8, 16  ;;  %v3009_v19 = vld [vmem:[%s2888_s23 + $0x40] sm:$0xf] }
  0x2f   : >> { %2361 = vmatmul.msk.bf16.vlgmr.msra.gmra.mxu2 %vm481_vm3, %v476_v22  ;;  %v470_v34 = vunpack.c.l.b16 %v430_v27  ;;  %v318_v35 = vor.u32 %v317_v23, %v314_v12  ;;  %v333_v36 = vrot.slane %v331_v24, 5  ;;  %v362_v37 = vrot.slane %v360_v26, 4  ;;  %v3002_v12 = vld [vmem:[%s2888_s23 + $0x3c] sm:$0xf]  ;;  %v3012_v27 = vld [vmem:[%s2888_s23 + $0x44] sm:$0x1]  ;;  %p2715_p0 = pneg (%p226_p11), %p2714_p13 }
  0x30   : >> { %v328_v38 = vor.u32 %v327_v31, %v323_v28  ;;  %v365_v39 = vrot.slane %v363_v32, 5  ;;  %v369_v41 = vshll.u32 %v2966_v21, 16  ;;  %v373_v42 = vshrl.u32 %v2966_v21, 16 }
  0x31   : >> { %v479_v43 = vpack.c.b16 %v470_v34, %v469_v17  ;;  %v319_v44 = vrot.slane %v318_v35, 4  ;;  %v379_v45 = vshll.u32 %v2970_v25, 16  ;;  %v432_v47 = vshrl.u32 %v2977_v33, 16  ;;  %p2720_p4 = pnand (%p226_p11), %p2719_p3, %p2715_p0 }
  0x32   : >> { %v329_v49 = vrot.slane %v328_v38, 4  ;;  %v366_v50 = vor.u32 %v365_v39, %v362_v37  ;;  %v371_v51 = vrot.slane %v369_v41, 5  ;;  %v375_v52 = vrot.slane %v373_v42, 4  ;;  %v3020_v39 = vld [vmem:[%s2888_s23] sm:$0xf] }
  0x33   : >> { %2364 = vmatmul.msk.bf16.vlgmr.msra.gmra.mxu3 %vm481_vm3, %v479_v43  ;;  %v324_v54 = vsel %vm2926_vm4, %v319_v44, %v323_v28  ;;  %v381_v55 = vrot.slane %v379_v45, 5  ;;  %v434_v56 = vrot.slane %v432_v47, 4  ;;  %v435_v57 = vshll.u32 %v2977_v33, 16  ;;  %v3025_v45 = vld [vmem:[%s2888_s23 + $0x4] sm:$0xf] }
  0x34   : >> { %v334_v59 = vsel %vm2926_vm4, %v329_v49, %v333_v36  ;;  %v461_v61 = vunpack.c.l.b16 %v324_v54  ;;  %v367_v62 = vrot.slane %v366_v50, 4  ;;  %v376_v63 = vor.u32 %v375_v52, %v371_v51  ;;  %v3031_v52 = vld [vmem:[%s2888_s23 + $0x8] sm:$0x1] }
  0x35   : >> { %v462_v2 = vunpack.c.l.b16 %v334_v59  ;;  %v437_v3 = vrot.slane %v435_v57, 5  ;;  %v441_v9 = vshll.u32 %v2984_v46, 16  ;;  %v445_v10 = vshrl.u32 %v2984_v46, 16 }
  0x36   : >> { %v372_v15 = vsel %vm2926_vm4, %v367_v62, %v371_v51  ;;  %v377_v16 = vrot.slane %v376_v63, 4  ;;  %v451_v17 = vshll.u32 %v2988_v53, 16  ;;  %v624_v18 = vsel %vm506_vm0, %v259_v58, 0 }
  0x37   : >> { %v475_v22 = vpack.c.b16 %v462_v2, %v461_v61  ;;  %v465_v23 = vunpack.c.l.b16 %v372_v15  ;;  %v438_v24 = vor.u32 %v437_v3, %v434_v56  ;;  %v443_v26 = vrot.slane %v441_v9, 5  ;;  %633 = vmatpush.bf16.msrb.mxu1 %v624_v18  ;;  %v2449_v9 = vld [vmem:[%s3880_s1 + $0x6] sm:$0x3]  ;;  %v2414_v18 = vld [vmem:[%s3880_s1 + $0x4] sm:$0x3] }
  0x38   : >> { %v382_v28 = vsel %vm2926_vm4, %v377_v16, %v381_v55  ;;  %v447_v31 = vrot.slane %v445_v10, 4  ;;  %v453_v32 = vrot.slane %v451_v17, 5  ;;  %v384_v34 = vshrl.u32 %v3002_v12, 16 }
  0x39   : >> { %v466_v35 = vunpack.c.l.b16 %v382_v28  ;;  %v439_v36 = vrot.slane %v438_v24, 4  ;;  %v387_v37 = vshll.u32 %v3002_v12, 16  ;;  %v393_v38 = vshll.u32 %v3009_v19, 16  ;;  %v2490_v28 = vld [vmem:[%s3880_s1 + $0x8] sm:$0x3] }
  0x3a   : >> { %v448_v41 = vor.u32 %v447_v31, %v443_v26  ;;  %v386_v42 = vrot.slane %v384_v34, 4  ;;  %v397_v43 = vshrl.u32 %v3009_v19, 16  ;;  %v403_v44 = vshll.u32 %v3012_v27, 16 }
  0x3b   : >> { %2360 = vmatmul.msk.bf16.gmra.mxu1 %vm481_vm3, %v475_v22  ;;  %v477_v47 = vpack.c.b16 %v466_v35, %v465_v23  ;;  %v444_v49 = vsel %vm2926_vm4, %v439_v36, %v443_v26  ;;  %v389_v50 = vrot.slane %v387_v37, 5  ;;  %v395_v51 = vrot.slane %v393_v38, 5  ;;  %v3052_v37 = vld [vmem:[%s2888_s23 + $0xc] sm:$0xf] }
  0x3c   : >> { %v449_v54 = vrot.slane %v448_v41, 4  ;;  %v471_v55 = vunpack.c.l.b16 %v444_v49  ;;  %v399_v56 = vrot.slane %v397_v43, 4  ;;  %v264_v58 = vshrl.u32 %v3020_v39, 16  ;;  %v3058_v43 = vld [vmem:[%s2888_s23 + $0x10] sm:$0xf] }
  0x3d   : >> { %v390_v57 = vor.u32 %v389_v50, %v386_v42  ;;  %v267_v59 = vshll.u32 %v3020_v39, 16  ;;  %v273_v61 = vshll.u32 %v3025_v45, 16  ;;  %v277_v2 = vshrl.u32 %v3025_v45, 16 }
  0x3e   : >> { %v454_v62 = vsel %vm2926_vm4, %v449_v54, %v453_v32  ;;  %v400_v63 = vor.u32 %v399_v56, %v395_v51  ;;  %v283_v3 = vshll.u32 %v3031_v52, 16  ;;  %v405_v15 = vrot.slane %v403_v44, 5 }
  0x3f   : >> { %2362 = vmatmul.msk.bf16.gmra.mxu2 %vm481_vm3, %v477_v47  ;;  %v472_v10 = vunpack.c.l.b16 %v454_v62  ;;  %v266_v16 = vrot.slane %v264_v58, 4  ;;  %v269_v17 = vrot.slane %v267_v59, 5  ;;  %v391_v22 = vrot.slane %v390_v57, 4  ;;  %v3070_v57 = vld [vmem:[%s2888_s23 + $0x14] sm:$0x1]  ;;  %v2612_v62 = vld [vmem:[%s2888_s23] sm:$0xff] }
  0x40   : >> { %v401_v23 = vrot.slane %v400_v63, 4  ;;  %v275_v24 = vrot.slane %v273_v61, 5  ;;  %v279_v26 = vrot.slane %v277_v2, 4  ;;  %v285_v35 = vrot.slane %v283_v3, 5 }
  0x41   : >> { %v480_v31 = vpack.c.b16 %v472_v10, %v471_v55  ;;  %v270_v32 = vor.u32 %v269_v17, %v266_v16  ;;  %v955_v36 = vsel %vm506_vm0, %v2449_v9, 0  ;;  %v793_v41 = vsel %vm506_vm0, %v2414_v18, 0 }
  0x42   : >> { %v280_v34 = vor.u32 %v279_v26, %v275_v24  ;;  %v1265_v42 = vsel %vm506_vm0, %v2490_v28, 0  ;;  %v396_v44 = vsel %vm2926_vm4, %v391_v22, %v395_v51  ;;  %v406_v47 = vsel %vm2926_vm4, %v401_v23, %v405_v15  ;;  %964 = vmatpush.bf16.msrb.mxu3 %v955_v36  ;;  %802 = vmatpush.bf16.msrb.mxu2 %v793_v41 }
  0x43   : >> { %2365 = vmatmul.msk.bf16.gmra.mxu3 %vm481_vm3, %v480_v31  ;;  %v271_v38 = vrot.slane %v270_v32, 4  ;;  %1274 = vmatpush.bf16.msrb.mxu0 %v1265_v42  ;;  %v1023_v54 = vshrl.u32 %v3052_v37, 16  ;;  %v1026_v51 = vshll.u32 %v3052_v37, 16  ;;  %v1032_v58 = vshll.u32 %v3058_v43, 16 }
  0x44   : >> { %v281_v49 = vrot.slane %v280_v34, 4  ;;  %v467_v59 = vunpack.c.l.b16 %v396_v44  ;;  %v468_v61 = vunpack.c.l.b16 %v406_v47  ;;  %v1036_v10 = vshrl.u32 %v3058_v43, 16  ;;  %v2620_v47 = vld [vmem:[%s2888_s23 + $0xc] sm:$0xff] }
  0x45   : >> { %v276_v50 = vsel %vm2926_vm4, %v271_v38, %v275_v24  ;;  %v1025_v2 = vrot.slane %v1023_v54, 4  ;;  %v1028_v3 = vrot.slane %v1026_v51, 5  ;;  %v1034_v9 = vrot.slane %v1032_v58, 5 }
  0x46   : >> { %v286_v55 = vsel %vm2926_vm4, %v281_v49, %v285_v35  ;;  %v457_v56 = vunpack.c.l.b16 %v276_v50  ;;  %v1042_v16 = vshll.u32 %v3070_v57, 16  ;;  %v688_v17 = vrot.slane %v3025_v45, 5  ;;  %v3088_v35 = vld [vmem:[%s2888_s23 + $0x18] sm:$0xf] }
  0x47   : >> { %v458_v63 = vunpack.c.l.b16 %v286_v55  ;;  %v1029_v18 = vor.u32 %v1028_v3, %v1025_v2  ;;  %v1038_v22 = vrot.slane %v1036_v10, 4  ;;  %v2407_v23 = vrot.slane %v2891_v4, 9  ;;  %v3091_v4 = vld [vmem:[%s2888_s23 + $0x1c] sm:$0xf] }
  0x48   : >> { %v478_v24 = vpack.c.b16 %v468_v61, %v467_v59  ;;  %v695_v26 = vrot.slane %v2894_v5, 5  ;;  %v698_v28 = vrot.slane %v2897_v6, 5  ;;  %v1044_v34 = vrot.slane %v1042_v16, 5 }
  0x49   : >> { %v473_v15 = vpack.c.b16 %v458_v63, %v457_v56  ;;  %v1030_v32 = vrot.slane %v1029_v18, 4  ;;  %v1039_v45 = vor.u32 %v1038_v22, %v1034_v9  ;;  %v691_v36 = vrot.slane %v3031_v52, 5  ;;  %v2613_v22 = vld [vmem:[%s2888_s23 + $0xc] sm:$0xff] }
  0x4a   : >> { %v696_v38 = vsel %vm3083_vm7, %v2407_v23, %v695_v26  ;;  %v697_v5 = vrot.slane %v695_v26, 4  ;;  %v2406_v41 = vrot.slane %v3020_v39, 9  ;;  %v690_v6 = vrot.slane %v688_v17, 4 }
  0x4b   : >> { %2398 = vmatmul.msk.bf16.vlgmr.msrb.gmra.mxu1 %vm481_vm3, %v2612_v62  ;;  %2358 = vmatmul.msk.bf16.vlgmr.msra.gmra.mxu0 %vm481_vm3, %v473_v15  ;;  %v1040_v42 = vrot.slane %v1039_v45, 4  ;;  %v746_v44 = vunpack.c.l.b16 %v696_v38  ;;  %v1047_v50 = vshrl.u32 %v3088_v35, 16  ;;  %v1050_v52 = vshll.u32 %v3088_v35, 16 }
  0x4c   : >> { %v699_v49 = vsel %vm3083_vm7, %v697_v5, %v698_v28  ;;  %v1056_v54 = vshll.u32 %v3091_v4, 16  ;;  %v1035_v55 = vsel %vm2926_vm4, %v1030_v32, %v1034_v9  ;;  %v1060_v51 = vshrl.u32 %v3091_v4, 16  ;;  %v3115_v9 = vld [vmem:[%s2888_s23 + $0x20] sm:$0x1] }
  0x4d   : >> { %v1045_v39 = vsel %vm2926_vm4, %v1040_v42, %v1044_v34  ;;  %v747_v56 = vunpack.c.l.b16 %v699_v49  ;;  %v689_v58 = vsel %vm3083_vm7, %v2406_v41, %v688_v17  ;;  %v1216_v61 = vunpack.c.l.b16 %v1035_v55  ;;  %v3129_v42 = vld [vmem:[%s2888_s23 + $0x24] sm:$0xf] }
  0x4e   : >> { %v1217_v62 = vunpack.c.l.b16 %v1045_v39  ;;  %v1049_v63 = vrot.slane %v1047_v50, 4  ;;  %v1052_v2 = vrot.slane %v1050_v52, 5  ;;  %v692_v3 = vsel %vm3083_vm7, %v690_v6, %v691_v36  ;;  %v2621_v50 = vld [vmem:[%s2888_s23 + $0x18] sm:$0xff] }
  0x4f   : >> { %2363 = vmatmul.msk.bf16.gmra.mxu2 %vm481_vm3, %v478_v24  ;;  %v761_v59 = vpack.c.b16 %v747_v56, %v746_v44  ;;  %v1058_v10 = vrot.slane %v1056_v54, 5  ;;  %v1062_v15 = vrot.slane %v1060_v51, 4  ;;  %v744_v16 = vunpack.c.l.b16 %v689_v58 }
  0x50   : >> { %v702_v18 = vrot.slane %v2948_v60, 5  ;;  %v745_v23 = vunpack.c.l.b16 %v692_v3  ;;  %v1232_v17 = vpack.c.b16 %v1217_v62, %v1216_v61  ;;  %v1053_v24 = vor.u32 %v1052_v2, %v1049_v63  ;;  %v3146_v3 = vld [vmem:[%s2888_s23 + $0x2c] sm:$0x1] }
  0x51   : >> { %v1066_v26 = vshll.u32 %v3115_v9, 16  ;;  %v1063_v28 = vor.u32 %v1062_v15, %v1058_v10  ;;  %v2408_v32 = vrot.slane %v2942_v48, 9  ;;  %v705_v34 = vrot.slane %v2954_v7, 5  ;;  %v3132_v7 = vld [vmem:[%s2888_s23 + $0x28] sm:$0xf] }
  0x52   : >> { %v704_v45 = vrot.slane %v702_v18, 4  ;;  %v760_v38 = vpack.c.b16 %v745_v23, %v744_v16  ;;  %v1054_v5 = vrot.slane %v1053_v24, 4  ;;  %v1071_v49 = vshrl.u32 %v3129_v42, 16 }
  0x53   : >> { %2482 = vmatmul.msk.bf16.vlgmr.msrb.gmra.mxu3 %vm481_vm3, %v2620_v47  ;;  %v703_v36 = vsel %vm3083_vm7, %v2408_v32, %v702_v18  ;;  %v1064_v48 = vrot.slane %v1063_v28, 4  ;;  %v1068_v44 = vrot.slane %v1066_v26, 5  ;;  %v1074_v54 = vshll.u32 %v3129_v42, 16  ;;  %v3153_v26 = vld [vmem:[%s2888_s23 + $0x30] sm:$0xf]  ;;  %v2622_v32 = vld [vmem:[%s2888_s23 + $0x24] sm:$0xff] }
  0x54   : >> { %v706_v60 = vsel %vm3083_vm7, %v704_v45, %v705_v34  ;;  %v748_v41 = vunpack.c.l.b16 %v703_v36  ;;  %v1059_v52 = vsel %vm2926_vm4, %v1054_v5, %v1058_v10  ;;  %v1080_v55 = vshll.u32 %v3132_v7, 16  ;;  %v2614_v10 = vld [vmem:[%s2888_s23 + $0x18] sm:$0xff]  ;;  %v3156_v28 = vld [vmem:[%s2888_s23 + $0x34] sm:$0xf] }
  0x55   : >> { %v749_v6 = vunpack.c.l.b16 %v706_v60  ;;  %v1084_v39 = vshrl.u32 %v3132_v7, 16  ;;  %v1069_v56 = vsel %vm2926_vm4, %v1064_v48, %v1068_v44  ;;  %v1218_v51 = vunpack.c.l.b16 %v1059_v52  ;;  %v2615_v52 = vld [vmem:[%s2888_s23 + $0x24] sm:$0xff] }
  0x56   : >> { %v1073_v58 = vrot.slane %v1071_v49, 4  ;;  %v1219_v61 = vunpack.c.l.b16 %v1069_v56  ;;  %v1076_v62 = vrot.slane %v1074_v54, 5  ;;  %v1082_v63 = vrot.slane %v1080_v55, 5 }
  0x57   : >> { %v762_v47 = vpack.c.b16 %v749_v6, %v748_v41  ;;  %v1086_v2 = vrot.slane %v1084_v39, 4  ;;  %v1095_v36 = vshrl.u32 %v3153_v26, 16  ;;  %v1098_v60 = vshll.u32 %v3153_v26, 16 }
  0x58   : >> { %v1233_v15 = vpack.c.b16 %v1219_v61, %v1218_v51  ;;  %v1077_v16 = vor.u32 %v1076_v62, %v1073_v58  ;;  %v1108_v5 = vshrl.u32 %v3156_v28, 16  ;;  %v3177_v51 = vld [vmem:[%s2888_s23 + $0x3c] sm:$0xf]  ;;  %v3180_v58 = vld [vmem:[%s2888_s23 + $0x40] sm:$0xf]  ;;  %v709_v61 = vrot.slane %v2908_v13, 5 }
  0x59   : >> { %v1087_v18 = vor.u32 %v1086_v2, %v1082_v63  ;;  %v1097_v6 = vrot.slane %v1095_v36, 4  ;;  %v1100_v48 = vrot.slane %v1098_v60, 5  ;;  %v712_v13 = vrot.slane %v2911_v14, 5 }
  0x5a   : >> { %v1078_v23 = vrot.slane %v1077_v16, 4  ;;  %v1110_v49 = vrot.slane %v1108_v5, 4  ;;  %v1128_v16 = vshll.u32 %v3180_v58, 16  ;;  %v3197_v5 = vld [vmem:[%s2888_s23 + $0x44] sm:$0x1] }
  0x5b   : >> { %2399 = vmatmul.msk.bf16.gmra.mxu1 %vm481_vm3, %v2613_v22  ;;  %2491 = vmatmul.msk.bf16.vlgmr.msrb.gmra.mxu0 %vm481_vm3, %v1232_v17  ;;  %v1090_v22 = vshll.u32 %v3146_v3, 16  ;;  %v1088_v17 = vrot.slane %v1087_v18, 4  ;;  %v1101_v55 = vor.u32 %v1100_v48, %v1097_v6  ;;  %v1132_v18 = vshrl.u32 %v3180_v58, 16  ;;  %v2616_v48 = vld [vmem:[%s2888_s23 + $0x30] sm:$0xff] }
  0x5c   : >> { %v1083_v45 = vsel %vm2926_vm4, %v1078_v23, %v1082_v63  ;;  %v2409_v23 = vrot.slane %v2904_v11, 9  ;;  %v1130_v36 = vrot.slane %v1128_v16, 5  ;;  %v1138_v6 = vshll.u32 %v3197_v5, 16 }
  0x5d   : >> { %v1092_v24 = vrot.slane %v1090_v22, 5  ;;  %v1102_v62 = vrot.slane %v1101_v55, 4  ;;  %v2623_v22 = vld [vmem:[%s2888_s23 + $0x30] sm:$0xff]  ;;  %v1134_v60 = vrot.slane %v1132_v18, 4  ;;  %v2624_v18 = vld [vmem:[%s2888_s23 + $0x3c] sm:$0xff] }
  0x5e   : >> { %v710_v11 = vsel %vm3083_vm7, %v2409_v23, %v709_v61 }
  0x5f   : >> { %2415 = vmatmul.msk.bf16.vlgmr.msrb.gmra.mxu2 %vm481_vm3, %v760_v38  ;;  %v1093_v34 = vsel %vm2926_vm4, %v1088_v17, %v1092_v24  ;;  %v1104_v38 = vshll.u32 %v3156_v28, 16  ;;  %v711_v17 = vrot.slane %v709_v61, 4 }
  0x60   : >> { %v1221_v41 = vunpack.c.l.b16 %v1093_v34 }
  0x61   : >> { %v1106_v44 = vrot.slane %v1104_v38, 5  ;;  %v713_v14 = vsel %vm3083_vm7, %v711_v17, %v712_v13 }
  0x63   : >> { %2483 = vmatmul.msk.bf16.gmra.mxu3 %vm481_vm3, %v2621_v50  ;;  %v3170_v50 = vld [vmem:[%s2888_s23 + $0x38] sm:$0x1]  ;;  %v1111_v39 = vor.u32 %v1110_v49, %v1106_v44  ;;  %v1107_v24 = vsel %vm2926_vm4, %v1102_v62, %v1106_v44  ;;  %v750_v44 = vunpack.c.l.b16 %v710_v11  ;;  %v751_v49 = vunpack.c.l.b16 %v713_v14  ;;  %v3209_v62 = vld [vmem:[%s2888_s23 + $0x48] sm:$0xf]  ;;  %v2617_v14 = vld [vmem:[%s2888_s23 + $0x3c] sm:$0xff] }
  0x64   : >> { %v1114_v56 = vshll.u32 %v3170_v50, 16  ;;  %v1146_v23 = vshll.u32 %v3209_v62, 16 }
  0x65   : >> { %v1112_v63 = vrot.slane %v1111_v39, 4  ;;  %v763_v61 = vpack.c.b16 %v751_v49, %v750_v44  ;;  %v723_v44 = vrot.slane %v3009_v19, 5 }
  0x66   : >> { %v1116_v2 = vrot.slane %v1114_v56, 5  ;;  %v1140_v56 = vrot.slane %v1138_v6, 5 }
  0x6b   : >> { %2400 = vmatmul.msk.bf16.gmra.mxu1 %vm481_vm3, %v2614_v10  ;;  %2492 = vmatmul.msk.bf16.gmra.mxu0 %vm481_vm3, %v1233_v15  ;;  %v1119_v10 = vshrl.u32 %v3177_v51, 16  ;;  %v1122_v15 = vshll.u32 %v3177_v51, 16 }
  0x6d   : >> { %v1124_v34 = vrot.slane %v1122_v15, 5  ;;  %v719_v15 = vrot.slane %v2970_v25, 5 }
  0x6f   : >> { %2416 = vmatmul.msk.bf16.gmra.mxu2 %vm481_vm3, %v761_v59  ;;  %v1220_v59 = vunpack.c.l.b16 %v1083_v45  ;;  %v1121_v45 = vrot.slane %v1119_v10, 4 }
  0x71   : >> { %v1234_v54 = vpack.c.b16 %v1221_v41, %v1220_v59  ;;  %v1125_v59 = vor.u32 %v1124_v34, %v1121_v45  ;;  %v1135_v41 = vor.u32 %v1134_v60, %v1130_v36  ;;  %v1148_v34 = vrot.slane %v1146_v23, 5 }
  0x73   : >> { %2484 = vmatmul.msk.bf16.gmra.mxu3 %vm481_vm3, %v2622_v32  ;;  %v1117_v32 = vsel %vm2926_vm4, %v1112_v63, %v1116_v2  ;;  %v1126_v55 = vrot.slane %v1125_v59, 4  ;;  %v1136_v39 = vrot.slane %v1135_v41, 4  ;;  %v3212_v63 = vld [vmem:[%s2888_s23 + $0x4c] sm:$0xf]  ;;  %v2410_v2 = vrot.slane %v2957_v8, 9 }
  0x74   : >> { %v1223_v38 = vunpack.c.l.b16 %v1117_v32  ;;  %v1152_v8 = vshll.u32 %v3212_v63, 16  ;;  %v1156_v17 = vshrl.u32 %v3212_v63, 16 }
  0x75   : >> { %v1141_v16 = vsel %vm2926_vm4, %v1136_v39, %v1140_v56  ;;  %v3240_v39 = vld [vmem:[%s2888_s23 + $0x54] sm:$0xf]  ;;  %v3243_v56 = vld [vmem:[%s2888_s23 + $0x58] sm:$0xf] }
  0x76   : >> { %v1225_v32 = vunpack.c.l.b16 %v1141_v16  ;;  %v1158_v60 = vrot.slane %v1156_v17, 4  ;;  %v1170_v19 = vshll.u32 %v3240_v39, 16 }
  0x7b   : >> { %2401 = vmatmul.msk.bf16.gmra.mxu1 %vm481_vm3, %v2615_v52  ;;  %2493 = vmatmul.msk.bf16.gmra.mxu0 %vm481_vm3, %v1234_v54  ;;  %v716_v54 = vrot.slane %v2966_v21, 5  ;;  %v1131_v21 = vsel %vm2926_vm4, %v1126_v55, %v1130_v36  ;;  %v1154_v36 = vrot.slane %v1152_v8, 5 }
  0x7d   : >> { %v718_v10 = vrot.slane %v716_v54, 4  ;;  %v717_v25 = vsel %vm3083_vm7, %v2410_v2, %v716_v54  ;;  %v1159_v6 = vor.u32 %v1158_v60, %v1154_v36  ;;  %v725_v2 = vrot.slane %v723_v44, 4 }
  0x7f   : >> { %2417 = vmatmul.msk.bf16.gmra.mxu2 %vm481_vm3, %v762_v47  ;;  %v1222_v47 = vunpack.c.l.b16 %v1107_v24  ;;  %v720_v13 = vsel %vm3083_vm7, %v718_v10, %v719_v15  ;;  %v1224_v24 = vunpack.c.l.b16 %v1131_v21  ;;  %v1160_v54 = vrot.slane %v1159_v6, 4  ;;  %v2625_v21 = vld [vmem:[%s2888_s23 + $0x48] sm:$0xff] }
  0x80   : >> { %v753_v11 = vunpack.c.l.b16 %v720_v13  ;;  %v726_v10 = vrot.slane %v3012_v27, 5  ;;  %v1167_v15 = vshrl.u32 %v3240_v39, 16  ;;  %v1180_v27 = vshrl.u32 %v3243_v56, 16  ;;  %v2618_v6 = vld [vmem:[%s2888_s23 + $0x48] sm:$0xff] }
  0x81   : >> { %v1235_v52 = vpack.c.b16 %v1223_v38, %v1222_v47  ;;  %v3232_v47 = vld [vmem:[%s2888_s23 + $0x50] sm:$0x1]  ;;  %v752_v38 = vunpack.c.l.b16 %v717_v25  ;;  %v1236_v59 = vpack.c.b16 %v1225_v32, %v1224_v24  ;;  %v1172_v32 = vrot.slane %v1170_v19, 5 }
  0x82   : >> { %v727_v17 = vsel %vm3083_vm7, %v725_v2, %v726_v10  ;;  %v1169_v24 = vrot.slane %v1167_v15, 4  ;;  %v1182_v60 = vrot.slane %v1180_v27, 4  ;;  %v2600_v2 = vld [vmem:[%s3880_s1 + $0x10] sm:$0x3]  ;;  %v2626_v27 = vld [vmem:[%s2888_s23 + $0x54] sm:$0xff] }
  0x83   : >> { %2485 = vmatmul.msk.bf16.gmra.mxu3 %vm481_vm3, %v2623_v22  ;;  %v1143_v22 = vshrl.u32 %v3209_v62, 16  ;;  %v764_v49 = vpack.c.b16 %v753_v11, %v752_v38 }
  0x85   : >> { %v1145_v45 = vrot.slane %v1143_v22, 4  ;;  %v1176_v22 = vshll.u32 %v3243_v56, 16 }
  0x87   : >> { %v1149_v41 = vor.u32 %v1148_v34, %v1145_v45  ;;  %v2583_v45 = vld [vmem:[%s3880_s1 + $0xe] sm:$0x3]  ;;  %v2507_v34 = vld [vmem:[%s3880_s1 + $0xa] sm:$0x3] }
  0x88   : >> { %v1919_v38 = vsel %vm506_vm0, %v2583_v45, 0  ;;  %v1447_v11 = vsel %vm506_vm0, %v2507_v34, 0 }
  0x89   : >> { %1928 = vmatpush.bf16.msra.mxu3 %v1919_v38  ;;  %1456 = vmatpush.bf16.msra.mxu1 %v1447_v11 }
  0x8b   : >> { %2402 = vmatmul.msk.bf16.gmra.mxu1 %vm481_vm3, %v2616_v48  ;;  %2494 = vmatmul.msk.bf16.gmra.mxu0 %vm481_vm3, %v1235_v52  ;;  %v1162_v48 = vshll.u32 %v3232_v47, 16  ;;  %v1150_v52 = vrot.slane %v1149_v41, 4  ;;  %v755_v41 = vunpack.c.l.b16 %v727_v17 }
  0x8d   : >> { %v1164_v55 = vrot.slane %v1162_v48, 5  ;;  %v1155_v16 = vsel %vm2926_vm4, %v1150_v52, %v1154_v36  ;;  %v1178_v36 = vrot.slane %v1176_v22, 5  ;;  %v733_v22 = vrot.slane %v2933_v40, 5 }
  0x8e   : >> { %v1226_v25 = vunpack.c.l.b16 %v1155_v16  ;;  %v3289_v16 = vld [vmem:[%s2888_s23 + $0x60] sm:$0xf] }
  0x8f   : >> { %2418 = vmatmul.msk.bf16.gmra.mxu2 %vm481_vm3, %v763_v61  ;;  %v2411_v61 = vrot.slane %v3002_v12, 9  ;;  %v2542_v12 = vld [vmem:[%s3880_s1 + $0xc] sm:$0x3]  ;;  %v1191_v17 = vshrl.u32 %v3289_v16, 16 }
  0x90   : >> { %v1609_v23 = vsel %vm506_vm0, %v2542_v12, 0 }
  0x91   : >> { %v724_v8 = vsel %vm3083_vm7, %v2411_v61, %v723_v44  ;;  %1618 = vmatpush.bf16.msra.mxu2 %v1609_v23  ;;  %v1173_v44 = vor.u32 %v1172_v32, %v1169_v24  ;;  %v730_v61 = vrot.slane %v2922_v29, 5  ;;  %v2412_v29 = vrot.slane %v2915_v20, 9 }
  0x93   : >> { %2486 = vmatmul.msk.bf16.gmra.mxu3 %vm481_vm3, %v2624_v18  ;;  %v1165_v18 = vsel %vm2926_vm4, %v1160_v54, %v1164_v55  ;;  %v1174_v10 = vrot.slane %v1173_v44, 4  ;;  %v732_v12 = vrot.slane %v730_v61, 4  ;;  %v731_v34 = vsel %vm3083_vm7, %v2412_v29, %v730_v61 }
  0x94   : >> { %v1227_v13 = vunpack.c.l.b16 %v1165_v18  ;;  %v3292_v18 = vld [vmem:[%s2888_s23 + $0x64] sm:$0xf]  ;;  %v1342_v61 = vrot.slane %v3058_v43, 5 }
  0x95   : >> { %v1179_v23 = vsel %vm2926_vm4, %v1174_v10, %v1178_v36  ;;  %v1200_v40 = vshll.u32 %v3292_v18, 16 }
  0x96   : >> { %v1237_v48 = vpack.c.b16 %v1227_v13, %v1226_v25  ;;  %v1194_v25 = vshll.u32 %v3289_v16, 16  ;;  %v1204_v13 = vshrl.u32 %v3292_v18, 16  ;;  %v1228_v32 = vunpack.c.l.b16 %v1179_v23 }
  0x97   : >> { %v1202_v11 = vrot.slane %v1200_v40, 5  ;;  %v1345_v23 = vrot.slane %v3070_v57, 5  ;;  %v1344_v40 = vrot.slane %v1342_v61, 4 }
  0x98   : >> { %v1196_v38 = vrot.slane %v1194_v25, 5  ;;  %v2499_v25 = vrot.slane %v3052_v37, 9 }
  0x9b   : >> { %2403 = vmatmul.msk.bf16.gmra.mxu1 %vm481_vm3, %v2617_v14  ;;  %2495 = vmatmul.msk.bf16.gmra.mxu0 %vm481_vm3, %v1236_v59  ;;  %v3275_v14 = vld [vmem:[%s2888_s23 + $0x5c] sm:$0x1]  ;;  %v754_v59 = vunpack.c.l.b16 %v724_v8 }
  0x9c   : >> { %v1186_v52 = vshll.u32 %v3275_v14, 16 }
  0x9d   : >> { %v765_v55 = vpack.c.b16 %v755_v41, %v754_v59  ;;  %v1206_v59 = vrot.slane %v1204_v13, 4  ;;  %v3316_v41 = vld [vmem:[%s2888_s23 + $0x18] sm:$0xf] }
  0x9e   : >> { %v1188_v19 = vrot.slane %v1186_v52, 5 }
  0x9f   : >> { %2419 = vmatmul.msk.bf16.gmra.mxu2 %vm481_vm3, %v764_v49  ;;  %v1183_v49 = vor.u32 %v1182_v60, %v1178_v36  ;;  %v734_v36 = vsel %vm3083_vm7, %v732_v12, %v733_v22  ;;  %v1193_v60 = vrot.slane %v1191_v17, 4  ;;  %v1207_v29 = vor.u32 %v1206_v59, %v1202_v11 }
  0xa0   : >> { %v757_v52 = vunpack.c.l.b16 %v734_v36  ;;  %v737_v17 = vrot.slane %v2984_v46, 5  ;;  %v2413_v46 = vrot.slane %v2977_v33, 9 }
  0xa1   : >> { %v1184_v15 = vrot.slane %v1183_v49, 4  ;;  %v756_v49 = vunpack.c.l.b16 %v731_v34  ;;  %v1197_v10 = vor.u32 %v1196_v38, %v1193_v60  ;;  %v1208_v34 = vrot.slane %v1207_v29, 4  ;;  %v3343_v38 = vld [vmem:[%s2888_s23 + $0x20] sm:$0x1] }
  0xa2   : >> { %v739_v37 = vrot.slane %v737_v17, 4 }
  0xa3   : >> { %2487 = vmatmul.msk.bf16.gmra.mxu3 %vm481_vm3, %v2625_v21  ;;  %v2101_v21 = vsel %vm506_vm0, %v2600_v2, 0  ;;  %v1189_v8 = vsel %vm2926_vm4, %v1184_v15, %v1188_v19  ;;  %v2619_v2 = vld [vmem:[%s2888_s23 + $0x54] sm:$0xff]  ;;  %v1677_v15 = vshrl.u32 %v3316_v41, 16  ;;  %v1680_v19 = vshll.u32 %v3316_v41, 16 }
  0xa4   : >> { %2110 = vmatpush.bf16.msra.mxu0 %v2101_v21  ;;  %v1229_v45 = vunpack.c.l.b16 %v1189_v8  ;;  %v766_v43 = vpack.c.b16 %v757_v52, %v756_v49  ;;  %v1198_v13 = vrot.slane %v1197_v10, 4  ;;  %v2627_v49 = vld [vmem:[%s2888_s23 + $0x60] sm:$0xff]  ;;  %v740_v52 = vrot.slane %v2988_v53, 5 }
  0xa5   : >> { %v1696_v53 = vshll.u32 %v3343_v38, 16 }
  0xa6   : >> { %v1203_v33 = vsel %vm2926_vm4, %v1198_v13, %v1202_v11  ;;  %v3371_v11 = vld [vmem:[%s2888_s23 + $0x28] sm:$0xf]  ;;  %v741_v13 = vsel %vm3083_vm7, %v739_v37, %v740_v52 }
  0xa8   : >> { %v3279_v54 = vpop.f32.mrf.mxu1 }
  0xab   : >> { %2404 = vmatmul.msk.bf16.gmra.mxu1 %vm481_vm3, %v2618_v6  ;;  %2496 = vmatmul.msk.bf16.gmra.mxu0 %vm481_vm3, %v1237_v48  ;;  %v3319_v6 = vld [vmem:[%s2888_s23 + $0x68] sm:$0x1]  ;;  %v3322_v48 = vld [vmem:[%s2888_s23 + $0x1c] sm:$0xf] }
  0xac   : >> { %v1210_v12 = vshll.u32 %v3319_v6, 16  ;;  %v1686_v22 = vshll.u32 %v3322_v48, 16 }
  0xae   : >> { %v1212_v36 = vrot.slane %v1210_v12, 5  ;;  %v1688_v60 = vrot.slane %v1686_v22, 5 }
  0xaf   : >> { %2420 = vmatmul.msk.bf16.gmra.mxu2 %vm481_vm3, %v765_v55  ;;  %v1238_v55 = vpack.c.b16 %v1229_v45, %v1228_v32  ;;  %v1679_v32 = vrot.slane %v1677_v15, 4  ;;  %v1682_v45 = vrot.slane %v1680_v19, 5 }
  0xb0   : >> { %v3304_v20 = vpop.f32.mrf.mxu1  ;;  %v1213_v19 = vsel %vm2926_vm4, %v1208_v34, %v1212_v36  ;;  %v1349_v34 = vrot.slane %v3091_v4, 5 }
  0xb1   : >> { %v1683_v10 = vor.u32 %v1682_v45, %v1679_v32  ;;  %v1698_v45 = vrot.slane %v1696_v53, 5 }
  0xb2   : >> { %v3308_v24 = vpop.f32.mrf.mxu2  ;;  %v1351_v53 = vrot.slane %v1349_v34, 4 }
  0xb3   : >> { %2488 = vmatmul.msk.bf16.gmra.mxu3 %vm481_vm3, %v2626_v27  ;;  %v1690_v27 = vshrl.u32 %v3322_v48, 16 }
  0xb5   : >> { %v1692_v57 = vrot.slane %v1690_v27, 4 }
  0xb6   : >> { %v3324_v44 = vpop.f32.mrf.mxu3 }
  0xb7   : >> { %v1693_v29 = vor.u32 %v1692_v57, %v1688_v60 }
  0xb8   : >> { %v3330_v21 = vpop.f32.mrf.mxu1 }
  0xb9   : >> { %v1694_v32 = vrot.slane %v1693_v29, 4  ;;  %v2500_v29 = vrot.slane %v3088_v35, 9 }
  0xba   : >> { %v3336_v8 = vpop.f32.mrf.mxu2 }
  0xbb   : >> { %2405 = vmatmul.msk.bf16.gmra.mxu1 %vm481_vm3, %v2619_v2  ;;  %2497 = vmatmul.msk.bf16.gmra.mxu0 %vm481_vm3, %v1238_v55  ;;  %v1343_v55 = vsel %vm3083_vm7, %v2499_v25, %v1342_v61  ;;  %v1346_v2 = vsel %vm3083_vm7, %v1344_v40, %v1345_v23  ;;  %v738_v61 = vsel %vm3083_vm7, %v2413_v46, %v737_v17  ;;  %v1230_v23 = vunpack.c.l.b16 %v1203_v33  ;;  %v3368_v40 = vld [vmem:[%s2888_s23 + $0x24] sm:$0xf] }
  0xbc   : >> { %v1398_v22 = vunpack.c.l.b16 %v1343_v55  ;;  %v1399_v27 = vunpack.c.l.b16 %v1346_v2  ;;  %v1684_v25 = vrot.slane %v1683_v10, 4  ;;  %v758_v36 = vunpack.c.l.b16 %v738_v61 }
  0xbd   : >> { %v1996_v17 = vrot.slane %v3322_v48, 5  ;;  %v1701_v46 = vshrl.u32 %v3368_v40, 16  ;;  %v1710_v55 = vshll.u32 %v3371_v11, 16  ;;  %v1714_v2 = vshrl.u32 %v3371_v11, 16 }
  0xbe   : >> { %v3345_v59 = vpop.f32.mrf.mxu3  ;;  %v759_v10 = vunpack.c.l.b16 %v741_v13  ;;  %v1414_v33 = vpack.c.b16 %v1399_v27, %v1398_v22  ;;  %v1689_v52 = vsel %vm2926_vm4, %v1684_v25, %v1688_v60  ;;  %v1699_v48 = vsel %vm2926_vm4, %v1694_v32, %v1698_v45  ;;  %v3398_v45 = vld [vmem:[%s2888_s23 + $0x2c] sm:$0x1] }
  0xbf   : >> { %2421 = vmatmul.msk.bf16.gmra.mxu2 %vm481_vm3, %v766_v43  ;;  %v1231_v43 = vunpack.c.l.b16 %v1213_v19  ;;  %v1352_v61 = vrot.slane %v3115_v9, 5  ;;  %v2592_v13 = vrot.slane %v3316_v41, 9  ;;  %v1998_v22 = vrot.slane %v1996_v17, 4 }
  0xc0   : >> { %v3355_v15 = vpop.f32.mrf.mxu1  ;;  %v1999_v27 = vrot.slane %v3343_v38, 5  ;;  %v1703_v60 = vrot.slane %v1701_v46, 4  ;;  %v1712_v25 = vrot.slane %v1710_v55, 5  ;;  %v1716_v0 = vrot.slane %v1714_v2, 4 }
  0xc1   : >> { %v1239_v37 = vpack.c.b16 %v1231_v43, %v1230_v23  ;;  %v767_v32 = vpack.c.b16 %v759_v10, %v758_v36  ;;  %v1870_v35 = vunpack.c.l.b16 %v1689_v52  ;;  %v1871_v9 = vunpack.c.l.b16 %v1699_v48 }
  0xc2   : >> { %v3362_v12 = vpop.f32.mrf.mxu2  ;;  %v1350_v41 = vsel %vm3083_vm7, %v2500_v29, %v1349_v34  ;;  %v1353_v38 = vsel %vm3083_vm7, %v1351_v53, %v1352_v61  ;;  %v1997_v46 = vsel %vm3083_vm7, %v2592_v13, %v1996_v17  ;;  %v2000_v36 = vsel %vm3083_vm7, %v1998_v22, %v1999_v27  ;;  %v3418_v13 = vld [vmem:[%s2888_s23 + $0x30] sm:$0xf]  ;;  %v3421_v22 = vld [vmem:[%s2888_s23 + $0x34] sm:$0xf] }
  0xc3   : >> { %2489 = vmatmul.msk.bf16.gmra.mxu3 %vm481_vm3, %v2627_v49  ;;  %v1704_v49 = vshll.u32 %v3368_v40, 16  ;;  %v1717_v2 = vor.u32 %v1716_v0, %v1712_v25  ;;  %v1720_v10 = vshll.u32 %v3398_v45, 16  ;;  %v1886_v34 = vpack.c.b16 %v1871_v9, %v1870_v35 }
  0xc4   : >> { %v1400_v52 = vunpack.c.l.b16 %v1350_v41  ;;  %v1401_v17 = vunpack.c.l.b16 %v1353_v38  ;;  %v2053_v48 = vunpack.c.l.b16 %v2000_v36  ;;  %v1356_v9 = vrot.slane %v3132_v7, 5 }
  0xc5   : >> { %v1706_v43 = vrot.slane %v1704_v49, 5  ;;  %v1718_v61 = vrot.slane %v1717_v2, 4  ;;  %v1722_v0 = vrot.slane %v1720_v10, 5  ;;  %v2003_v41 = vrot.slane %v3371_v11, 5 }
  0xc6   : >> { %v3377_v57 = vpop.f32.mrf.mxu3  ;;  %v1415_v27 = vpack.c.b16 %v1401_v17, %v1400_v52  ;;  %v1725_v38 = vshrl.u32 %v3418_v13, 16  ;;  %v1734_v36 = vshll.u32 %v3421_v22, 16  ;;  %v1359_v2 = vrot.slane %v3146_v3, 5  ;;  %v2628_v3 = vld [vmem:[%s2888_s23 + $0x18] sm:$0xff] }
  0xc7   : >> { %v1707_v55 = vor.u32 %v1706_v43, %v1703_v60  ;;  %v1723_v35 = vsel %vm2926_vm4, %v1718_v61, %v1722_v0  ;;  %v2501_v11 = vrot.slane %v3129_v42, 9  ;;  %v1358_v52 = vrot.slane %v1356_v9, 4 }
  0xc8   : >> { %v635_v4 = vpop.f32.mrf.mxu1  ;;  %v519_v19 = vpop.f32.mrf.mxu0  ;;  %v2593_v17 = vrot.slane %v3368_v40, 9  ;;  %v1736_v61 = vrot.slane %v1734_v36, 5 }
  0xc9   : >> { %v3389_v1 = vadd.f32 %v635_v4, %v519_v19  ;;  %v2052_v19 = vunpack.c.l.b16 %v1997_v46  ;;  %v1708_v53 = vrot.slane %v1707_v55, 4  ;;  %v1728_v46 = vshll.u32 %v3418_v13, 16 }
  0xca   : >> { %v3393_v23 = vpop.f32.mrf.mxu2  ;;  %v1738_v55 = vshrl.u32 %v3421_v22, 16  ;;  %v1360_v40 = vsel %vm3083_vm7, %v1358_v52, %v1359_v2 }
  0xcb   : >> { %2508 = vmatmul.msk.bf16.vlgmr.msra.gmra.mxu1 %vm481_vm3, %v1414_v33  ;;  %2498 = vmatmul.msk.bf16.gmra.mxu0 %vm481_vm3, %v1239_v37  ;;  %v2068_v60 = vpack.c.b16 %v2053_v48, %v2052_v19  ;;  %v2005_v19 = vrot.slane %v2003_v41, 4  ;;  %v2006_v48 = vrot.slane %v3398_v45, 5  ;;  %v2004_v45 = vsel %vm3083_vm7, %v2593_v17, %v2003_v41 }
  0xcc   : >> { %v1740_v0 = vrot.slane %v1738_v55, 4  ;;  %v2054_v41 = vunpack.c.l.b16 %v2004_v45 }
  0xce   : >> { %v3406_v49 = vpop.f32.mrf.mxu3 }
  0xcf   : >> { %2422 = vmatmul.msk.bf16.gmra.mxu2 %vm481_vm3, %v767_v32  ;;  %v1713_v32 = vsel %vm2926_vm4, %v1708_v53, %v1712_v25  ;;  %v1730_v53 = vrot.slane %v1728_v46, 5 }
  0xd0   : >> { %v637_v33 = vpop.f32.mrf.mxu1  ;;  %v521_v37 = vpop.f32.mrf.mxu0  ;;  %v1872_v7 = vunpack.c.l.b16 %v1713_v32  ;;  %v3446_v32 = vld [vmem:[%s2888_s23 + $0x38] sm:$0x1] }
  0xd1   : >> { %v3412_v4 = vadd.f32 %v637_v33, %v521_v37  ;;  %v1873_v33 = vunpack.c.l.b16 %v1723_v35  ;;  %v1744_v46 = vshll.u32 %v3446_v32, 16 }
  0xd2   : >> { %v3414_v29 = vpop.f32.mrf.mxu2 }
  0xd3   : >> { %2584 = vmatmul.msk.bf16.vlgmr.msra.gmra.mxu3 %vm481_vm3, %v1886_v34  ;;  %v1887_v35 = vpack.c.b16 %v1873_v33, %v1872_v7  ;;  %v1403_v33 = vunpack.c.l.b16 %v1360_v40 }
  0xd6   : >> { %v966_v43 = vpop.f32.mrf.mxu3 }
  0xd8   : >> { %v640_v10 = vpop.f32.mrf.mxu1  ;;  %v1276_v25 = vpop.f32.mrf.mxu0 }
  0xd9   : >> { %v3435_v34 = vadd.f32 %v640_v10, %v3279_v54  ;;  %v1727_v54 = vrot.slane %v1725_v38, 4  ;;  %v1357_v10 = vsel %vm3083_vm7, %v2501_v11, %v1356_v9  ;;  %v1741_v38 = vor.u32 %v1740_v0, %v1736_v61 }
  0xda   : >> { %v3438_v37 = vpop.f32.mrf.mxu2  ;;  %v1402_v7 = vunpack.c.l.b16 %v1357_v10  ;;  %v1363_v10 = vrot.slane %v3156_v28, 5 }
  0xdb   : >> { %2509 = vmatmul.msk.bf16.gmra.mxu1 %vm481_vm3, %v1415_v27  ;;  %2601 = vmatmul.msk.bf16.vlgmr.msra.gmra.mxu0 %vm481_vm3, %v2068_v60  ;;  %v2007_v27 = vsel %vm3083_vm7, %v2005_v19, %v2006_v48  ;;  %v1731_v60 = vor.u32 %v1730_v53, %v1727_v54  ;;  %v1742_v19 = vrot.slane %v1741_v38, 4  ;;  %v1746_v48 = vrot.slane %v1744_v46, 5  ;;  %v3464_v54 = vld [vmem:[%s2888_s23 + $0x3c] sm:$0xf]  ;;  %v3467_v53 = vld [vmem:[%s2888_s23 + $0x40] sm:$0xf] }
  0xdc   : >> { %v2055_v11 = vunpack.c.l.b16 %v2007_v27  ;;  %v1752_v38 = vshll.u32 %v3464_v54, 16  ;;  %v1758_v46 = vshll.u32 %v3467_v53, 16  ;;  %v1762_v28 = vshrl.u32 %v3467_v53, 16 }
  0xdd   : >> { %v1732_v17 = vrot.slane %v1731_v60, 4  ;;  %v1749_v60 = vshrl.u32 %v3464_v54, 16 }
  0xde   : >> { %v968_v42 = vpop.f32.mrf.mxu3 }
  0xdf   : >> { %2575 = vmatmul.msk.bf16.vlgmr.msra.gmra.mxu2 %vm481_vm3, %v2628_v3  ;;  %v1737_v40 = vsel %vm2926_vm4, %v1732_v17, %v1736_v61  ;;  %v1366_v61 = vrot.slane %v3170_v50, 5  ;;  %v2594_v17 = vrot.slane %v3418_v13, 9 }
  0xe0   : >> { %v642_v36 = vpop.f32.mrf.mxu1  ;;  %v1278_v55 = vpop.f32.mrf.mxu0 }
  0xe1   : >> { %v3459_v9 = vadd.f32 %v642_v36, %v3304_v20  ;;  %v1416_v20 = vpack.c.b16 %v1403_v33, %v1402_v7  ;;  %v2069_v36 = vpack.c.b16 %v2055_v11, %v2054_v41  ;;  %v2502_v33 = vrot.slane %v3153_v26, 9 }
  0xe2   : >> { %v804_v2 = vpop.f32.mrf.mxu2  ;;  %v1365_v41 = vrot.slane %v1363_v10, 4 }
  0xe3   : >> { %v844_v52 = vadd.f32 %v804_v2, %v3389_v1  ;;  %2585 = vmatmul.msk.bf16.gmra.mxu3 %vm481_vm3, %v1887_v35  ;;  %v1747_v1 = vsel %vm2926_vm4, %v1742_v19, %v1746_v48  ;;  %v2010_v35 = vrot.slane %v3421_v22, 5  ;;  %v1874_v22 = vunpack.c.l.b16 %v1737_v40 }
  0xe4   : >> { %v1751_v19 = vrot.slane %v1749_v60, 4  ;;  %v1754_v48 = vrot.slane %v1752_v38, 5  ;;  %v1764_v40 = vrot.slane %v1762_v28, 4  ;;  %v1367_v13 = vsel %vm3083_vm7, %v1365_v41, %v1366_v61 }
  0xe5   : >> { %v1006_v3 = vadd.f32 %v966_v43, %v844_v52  ;;  %v2629_v52 = vld [vmem:[%s2888_s23 + $0x24] sm:$0xff]  ;;  %v2012_v50 = vrot.slane %v2010_v35, 4 }
  0xe6   : >> { %v971_v0 = vpop.f32.mrf.mxu3 }
  0xe7   : >> { %v3475_v45 = vadd.f32 %v1276_v25, %v1006_v3  ;;  %v1875_v25 = vunpack.c.l.b16 %v1747_v1  ;;  %v1760_v3 = vrot.slane %v1758_v46, 5  ;;  %v1755_v46 = vor.u32 %v1754_v48, %v1751_v19 }
  0xe8   : >> { %v645_v43 = vpop.f32.mrf.mxu1  ;;  %v1281_v27 = vpop.f32.mrf.mxu0 }
  0xe9   : >> { %v3483_v2 = vadd.f32 %v645_v43, %v3330_v21  ;;  %v2013_v21 = vrot.slane %v3446_v32, 5  ;;  %v3493_v43 = vld [vmem:[%s2888_s23 + $0x44] sm:$0x1]  ;;  %v2011_v32 = vsel %vm3083_vm7, %v2594_v17, %v2010_v35  ;;  %v1765_v28 = vor.u32 %v1764_v40, %v1760_v3 }
  0xea   : >> { %v806_v7 = vpop.f32.mrf.mxu2  ;;  %v1405_v35 = vunpack.c.l.b16 %v1367_v13 }
  0xeb   : >> { %v845_v11 = vadd.f32 %v806_v7, %v3412_v4  ;;  %2510 = vmatmul.msk.bf16.gmra.mxu1 %vm481_vm3, %v1416_v20  ;;  %2602 = vmatmul.msk.bf16.gmra.mxu0 %vm481_vm3, %v2069_v36  ;;  %v1888_v4 = vpack.c.b16 %v1875_v25, %v1874_v22  ;;  %v1364_v20 = vsel %vm3083_vm7, %v2502_v33, %v1363_v10  ;;  %v1768_v7 = vshll.u32 %v3493_v43, 16  ;;  %v3511_v25 = vld [vmem:[%s2888_s23 + $0x48] sm:$0xf] }
  0xec   : >> { %v2014_v38 = vsel %vm3083_vm7, %v2012_v50, %v2013_v21  ;;  %v1404_v61 = vunpack.c.l.b16 %v1364_v20  ;;  %v2056_v33 = vunpack.c.l.b16 %v2011_v32  ;;  %v1766_v17 = vrot.slane %v1765_v28, 4 }
  0xed   : >> { %v1007_v1 = vadd.f32 %v968_v42, %v845_v11  ;;  %v2057_v41 = vunpack.c.l.b16 %v2014_v38  ;;  %v3516_v11 = vld [vmem:[%s2888_s23 + $0x4c] sm:$0xf]  ;;  %v1770_v50 = vrot.slane %v1768_v7, 5  ;;  %v1776_v19 = vshll.u32 %v3511_v25, 16 }
  0xee   : >> { %v973_v26 = vpop.f32.mrf.mxu3  ;;  %v1782_v40 = vshll.u32 %v3516_v11, 16  ;;  %v1370_v38 = vrot.slane %v3180_v58, 5 }
  0xef   : >> { %2576 = vmatmul.msk.bf16.gmra.mxu2 %vm481_vm3, %v2629_v52  ;;  %v3502_v36 = vadd.f32 %v1278_v55, %v1007_v1  ;;  %v1756_v52 = vrot.slane %v1755_v46, 4  ;;  %v1417_v1 = vpack.c.b16 %v1405_v35, %v1404_v61  ;;  %v2017_v46 = vrot.slane %v3467_v53, 5 }
  0xf0   : >> { %v647_v42 = vpop.f32.mrf.mxu1  ;;  %v1283_v60 = vpop.f32.mrf.mxu0  ;;  %v1778_v7 = vrot.slane %v1776_v19, 5  ;;  %v2503_v53 = vrot.slane %v3177_v51, 9 }
  0xf1   : >> { %v3508_v10 = vadd.f32 %v647_v42, %v3355_v15  ;;  %v1773_v15 = vshrl.u32 %v3511_v25, 16  ;;  %v1771_v42 = vsel %vm2926_vm4, %v1766_v17, %v1770_v50  ;;  %v2595_v17 = vrot.slane %v3464_v54, 9 }
  0xf2   : >> { %v809_v22 = vpop.f32.mrf.mxu2  ;;  %v2020_v50 = vrot.slane %v3493_v43, 5  ;;  %v1371_v51 = vsel %vm3083_vm7, %v2503_v53, %v1370_v38 }
  0xf3   : >> { %v846_v55 = vadd.f32 %v809_v22, %v3435_v34  ;;  %2586 = vmatmul.msk.bf16.gmra.mxu3 %vm481_vm3, %v1888_v4  ;;  %v1786_v34 = vshrl.u32 %v3516_v11, 16  ;;  %v2070_v4 = vpack.c.b16 %v2057_v41, %v2056_v33  ;;  %v1373_v22 = vrot.slane %v3197_v5, 5  ;;  %v2630_v33 = vld [vmem:[%s2888_s23 + $0x30] sm:$0xff] }
  0xf4   : >> { %v1877_v41 = vunpack.c.l.b16 %v1771_v42  ;;  %v2019_v5 = vrot.slane %v2017_v46, 4 }
  0xf5   : >> { %v1008_v21 = vadd.f32 %v971_v0, %v846_v55  ;;  %v1761_v0 = vsel %vm2926_vm4, %v1756_v52, %v1760_v3  ;;  %v1784_v55 = vrot.slane %v1782_v40, 5  ;;  %v1788_v35 = vrot.slane %v1786_v34, 4 }
  0xf6   : >> { %v976_v48 = vpop.f32.mrf.mxu3  ;;  %v1876_v58 = vunpack.c.l.b16 %v1761_v0  ;;  %v1372_v52 = vrot.slane %v1370_v38, 4  ;;  %v1406_v38 = vunpack.c.l.b16 %v1371_v51 }
  0xf7   : >> { %v3522_v20 = vadd.f32 %v1281_v27, %v1008_v21  ;;  %v1775_v27 = vrot.slane %v1773_v15, 4  ;;  %v1789_v19 = vor.u32 %v1788_v35, %v1784_v55 }
  0xf8   : >> { %v650_v13 = vpop.f32.mrf.mxu1  ;;  %v3524_v32 = vpop.f32.mrf.mxu0  ;;  %v1889_v34 = vpack.c.b16 %v1877_v41, %v1876_v58  ;;  %v1374_v43 = vsel %vm3083_vm7, %v1372_v52, %v1373_v22 }
  0xf9   : >> { %v3533_v28 = vadd.f32 %v650_v13, %v3308_v24  ;;  %v3542_v24 = vld [vmem:[%s2888_s23 + $0x50] sm:$0x1]  ;;  %v1779_v15 = vor.u32 %v1778_v7, %v1775_v27  ;;  %v2021_v13 = vsel %vm3083_vm7, %v2019_v5, %v2020_v50  ;;  %v1407_v22 = vunpack.c.l.b16 %v1374_v43 }
  0xfa   : >> { %v811_v61 = vpop.f32.mrf.mxu2  ;;  %v1792_v40 = vshll.u32 %v3542_v24, 16 }
  0xfb   : >> { %v847_v3 = vadd.f32 %v811_v61, %v3459_v9  ;;  %2511 = vmatmul.msk.bf16.gmra.mxu1 %vm481_vm3, %v1417_v1  ;;  %2603 = vmatmul.msk.bf16.gmra.mxu0 %vm481_vm3, %v2070_v4  ;;  %v1780_v42 = vrot.slane %v1779_v15, 4  ;;  %v3562_v61 = vld [vmem:[%s2888_s23 + $0x54] sm:$0xf] }
  0xfc   : >> { %v1794_v7 = vrot.slane %v1792_v40, 5  ;;  %v1797_v41 = vshrl.u32 %v3562_v61, 16  ;;  %v1800_v53 = vshll.u32 %v3562_v61, 16 }
  0xfd   : >> { %v1009_v21 = vadd.f32 %v973_v26, %v847_v3  ;;  %v2018_v26 = vsel %vm3083_vm7, %v2595_v17, %v2017_v46  ;;  %v2059_v46 = vunpack.c.l.b16 %v2021_v13  ;;  %v2504_v13 = vrot.slane %v3209_v62, 9 }
  0xfe   : >> { %v978_v9 = vpop.f32.mrf.mxu3  ;;  %v2058_v3 = vunpack.c.l.b16 %v2018_v26  ;;  %v1802_v43 = vrot.slane %v1800_v53, 5 }
  0xff   : >> { %2577 = vmatmul.msk.bf16.gmra.mxu2 %vm481_vm3, %v2630_v33  ;;  %v3550_v1 = vadd.f32 %v1283_v60, %v1009_v21  ;;  %v1790_v60 = vrot.slane %v1789_v19, 4  ;;  %v3567_v33 = vld [vmem:[%s2888_s23 + $0x58] sm:$0xf]  ;;  %v1418_v21 = vpack.c.b16 %v1407_v22, %v1406_v38  ;;  %v1380_v19 = vrot.slane %v3232_v47, 5 }
 0x100   : >> { %v652_v4 = vpop.f32.mrf.mxu1  ;;  %v1288_v54 = vpop.f32.mrf.mxu0  ;;  %v1806_v5 = vshll.u32 %v3567_v33, 16  ;;  %v1810_v50 = vshrl.u32 %v3567_v33, 16  ;;  %v2071_v15 = vpack.c.b16 %v2059_v46, %v2058_v3  ;;  %v2596_v47 = vrot.slane %v3511_v25, 9 }
 0x101   : >> { %v3559_v0 = vadd.f32 %v652_v4, %v3336_v8  ;;  %v1785_v8 = vsel %vm2926_vm4, %v1780_v42, %v1784_v55  ;;  %v1795_v17 = vsel %vm2926_vm4, %v1790_v60, %v1794_v7  ;;  %v1799_v4 = vrot.slane %v1797_v41, 4 }
 0x102   : >> { %v814_v27 = vpop.f32.mrf.mxu2  ;;  %v1878_v51 = vunpack.c.l.b16 %v1785_v8  ;;  %v2027_v7 = vrot.slane %v3542_v24, 5 }
 0x103   : >> { %v848_v35 = vadd.f32 %v814_v27, %v3483_v2  ;;  %2587 = vmatmul.msk.bf16.gmra.mxu3 %vm481_vm3, %v1889_v34  ;;  %v1377_v2 = vrot.slane %v3212_v63, 5  ;;  %v1879_v63 = vunpack.c.l.b16 %v1795_v17  ;;  %v1808_v27 = vrot.slane %v1806_v5, 5 }
 0x104   : >> { %v1803_v3 = vor.u32 %v1802_v43, %v1799_v4  ;;  %v3613_v43 = vld [vmem:[%s2888_s23 + $0x60] sm:$0xf] }
 0x105   : >> { %v1010_v58 = vadd.f32 %v976_v48, %v848_v35  ;;  %v2024_v48 = vrot.slane %v3516_v11, 5  ;;  %v1379_v42 = vrot.slane %v1377_v2, 4  ;;  %v1812_v11 = vrot.slane %v1810_v50, 4  ;;  %v3593_v35 = vld [vmem:[%s2888_s23 + $0x5c] sm:$0x1] }
 0x106   : >> { %v981_v52 = vpop.f32.mrf.mxu3  ;;  %v1378_v46 = vsel %vm3083_vm7, %v2504_v13, %v1377_v2  ;;  %v1816_v8 = vshll.u32 %v3593_v35, 16  ;;  %v1890_v25 = vpack.c.b16 %v1879_v63, %v1878_v51 }
 0x107   : >> { %v3580_v55 = vadd.f32 %v3524_v32, %v1010_v58  ;;  %v2631_v32 = vld [vmem:[%s2888_s23 + $0x3c] sm:$0xff]  ;;  %v2026_v60 = vrot.slane %v2024_v48, 4  ;;  %v1813_v58 = vor.u32 %v1812_v11, %v1808_v27  ;;  %v2025_v24 = vsel %vm3083_vm7, %v2596_v47, %v2024_v48 }
 0x108   : >> { %v3583_v40 = vpop.f32.mrf.mxu1  ;;  %v1291_v34 = vpop.f32.mrf.mxu0  ;;  %v1408_v5 = vunpack.c.l.b16 %v1378_v46  ;;  %v1818_v48 = vrot.slane %v1816_v8, 5  ;;  %v1821_v47 = vshrl.u32 %v3613_v43, 16 }
 0x109   : >> { %v1814_v63 = vrot.slane %v1813_v58, 4  ;;  %v2505_v58 = vrot.slane %v3240_v39, 9 }
 0x10a   : >> { %v816_v26 = vpop.f32.mrf.mxu2 }
 0x10b   : >> { %v849_v38 = vadd.f32 %v816_v26, %v3508_v10  ;;  %2512 = vmatmul.msk.bf16.gmra.mxu1 %vm481_vm3, %v1418_v21  ;;  %2604 = vmatmul.msk.bf16.gmra.mxu0 %vm481_vm3, %v2071_v15  ;;  %v1381_v10 = vsel %vm3083_vm7, %v1379_v42, %v1380_v19  ;;  %v1804_v21 = vrot.slane %v1803_v3, 4  ;;  %v2060_v19 = vunpack.c.l.b16 %v2025_v24 }
 0x10c   : >> { %v1409_v50 = vunpack.c.l.b16 %v1381_v10  ;;  %v1384_v42 = vrot.slane %v3243_v56, 5  ;;  %v1387_v56 = vrot.slane %v3275_v14, 5  ;;  %v2597_v24 = vrot.slane %v3562_v61, 9 }
 0x10d   : >> { %v1011_v22 = vadd.f32 %v978_v9, %v849_v38  ;;  %v2028_v9 = vsel %vm3083_vm7, %v2026_v60, %v2027_v7  ;;  %v1824_v60 = vshll.u32 %v3613_v43, 16 }
 0x10e   : >> { %v983_v62 = vpop.f32.mrf.mxu3  ;;  %v2061_v51 = vunpack.c.l.b16 %v2028_v9  ;;  %v1419_v13 = vpack.c.b16 %v1409_v50, %v1408_v5  ;;  %v1386_v8 = vrot.slane %v1384_v42, 4  ;;  %v2632_v5 = vld [vmem:[%s2888_s23 + $0x48] sm:$0xff]  ;;  %v1385_v61 = vsel %vm3083_vm7, %v2505_v58, %v1384_v42  ;;  %v3666_v58 = vld [vmem:[%s2888_s23 + $0x70] sm:$0xf] }
 0x10f   : >> { %2578 = vmatmul.msk.bf16.gmra.mxu2 %vm481_vm3, %v2631_v32  ;;  %v3605_v41 = vadd.f32 %v1288_v54, %v1011_v22  ;;  %v3616_v54 = vld [vmem:[%s2888_s23 + $0x64] sm:$0xf]  ;;  %v1819_v32 = vsel %vm2926_vm4, %v1814_v63, %v1818_v48  ;;  %v656_v42 = vadd.f32 %v3583_v40, %v3362_v12 }
 0x110   : >> { %v657_v53 = vpop.f32.mrf.mxu1  ;;  %v1293_v17 = vpop.f32.mrf.mxu0  ;;  %v2072_v38 = vpack.c.b16 %v2061_v51, %v2060_v19  ;;  %v1830_v7 = vshll.u32 %v3616_v54, 16 }
 0x111   : >> { %v3608_v2 = vadd.f32 %v657_v53, %v3393_v23  ;;  %v1809_v23 = vsel %vm2926_vm4, %v1804_v21, %v1808_v27  ;;  %v1823_v53 = vrot.slane %v1821_v47, 4 }
 0x112   : >> { %v819_v15 = vpop.f32.mrf.mxu2  ;;  %v1880_v46 = vunpack.c.l.b16 %v1809_v23  ;;  %v1832_v50 = vrot.slane %v1830_v7, 5 }
 0x113   : >> { %v850_v4 = vadd.f32 %v819_v15, %v3533_v28  ;;  %2588 = vmatmul.msk.bf16.gmra.mxu3 %vm481_vm3, %v1890_v25  ;;  %v2031_v28 = vrot.slane %v3567_v33, 5  ;;  %v1881_v33 = vunpack.c.l.b16 %v1819_v32  ;;  %v3642_v15 = vld [vmem:[%s2888_s23 + $0x68] sm:$0x1] }
 0x115   : >> { %v1012_v26 = vadd.f32 %v981_v52, %v850_v4  ;;  %v1834_v52 = vshrl.u32 %v3616_v54, 16  ;;  %v2033_v9 = vrot.slane %v2031_v28, 4  ;;  %v1891_v19 = vpack.c.b16 %v1881_v33, %v1880_v46  ;;  %v3663_v33 = vld [vmem:[%s2888_s23 + $0x6c] sm:$0xf] }
 0x116   : >> { %v986_v11 = vpop.f32.mrf.mxu3 }
 0x117   : >> { %v3628_v22 = vadd.f32 %v1291_v34, %v1012_v26  ;;  %v2034_v34 = vrot.slane %v3593_v35, 5  ;;  %v1836_v21 = vrot.slane %v1834_v52, 4  ;;  %v1388_v35 = vsel %vm3083_vm7, %v1386_v8, %v1387_v56 }
 0x118   : >> { %v660_v27 = vpop.f32.mrf.mxu1  ;;  %v1296_v3 = vpop.f32.mrf.mxu0  ;;  %v1411_v47 = vunpack.c.l.b16 %v1388_v35  ;;  %v1391_v8 = vrot.slane %v3292_v18, 5  ;;  %v1854_v18 = vshll.u32 %v3666_v58, 16  ;;  %v2633_v35 = vld [vmem:[%s2888_s23 + $0x54] sm:$0xff] }
 0x119   : >> { %v3632_v10 = vadd.f32 %v660_v27, %v3414_v29  ;;  %v1826_v29 = vrot.slane %v1824_v60, 5  ;;  %v2035_v63 = vsel %vm3083_vm7, %v2033_v9, %v2034_v34  ;;  %v1837_v4 = vor.u32 %v1836_v21, %v1832_v50 }
 0x11a   : >> { %v821_v25 = vpop.f32.mrf.mxu2  ;;  %v2063_v7 = vunpack.c.l.b16 %v2035_v63  ;;  %v2038_v9 = vrot.slane %v3616_v54, 5 }
 0x11b   : >> { %v851_v14 = vadd.f32 %v821_v25, %v3559_v0  ;;  %2513 = vmatmul.msk.bf16.gmra.mxu1 %vm481_vm3, %v1419_v13  ;;  %2605 = vmatmul.msk.bf16.gmra.mxu0 %vm481_vm3, %v2072_v38  ;;  %v2032_v0 = vsel %vm3083_vm7, %v2597_v24, %v2031_v28  ;;  %v1827_v48 = vor.u32 %v1826_v29, %v1823_v53  ;;  %v1410_v28 = vunpack.c.l.b16 %v1385_v61 }
 0x11c   : >> { %v2062_v60 = vunpack.c.l.b16 %v2032_v0  ;;  %v1838_v56 = vrot.slane %v1837_v4, 4  ;;  %v1858_v29 = vshrl.u32 %v3666_v58, 16  ;;  %v2598_v0 = vrot.slane %v3613_v43, 9 }
 0x11d   : >> { %v1013_v39 = vadd.f32 %v983_v62, %v851_v14  ;;  %v1840_v62 = vshll.u32 %v3642_v15, 16  ;;  %v1420_v40 = vpack.c.b16 %v1411_v47, %v1410_v28  ;;  %v1845_v14 = vshrl.u32 %v3663_v33, 16 }
 0x11e   : >> { %v988_v51 = vpop.f32.mrf.mxu3  ;;  %v2040_v63 = vrot.slane %v2038_v9, 4  ;;  %v2039_v43 = vsel %vm3083_vm7, %v2598_v0, %v2038_v9  ;;  %v2599_v0 = vrot.slane %v3663_v33, 9 }
 0x11f   : >> { %2579 = vmatmul.msk.bf16.gmra.mxu2 %vm481_vm3, %v2632_v5  ;;  %v3654_v26 = vadd.f32 %v1293_v17, %v1013_v39  ;;  %v1828_v17 = vrot.slane %v1827_v48, 4  ;;  %v1842_v27 = vrot.slane %v1840_v62, 5  ;;  %v1848_v5 = vshll.u32 %v3663_v33, 16 }
 0x120   : >> { %v662_v13 = vpop.f32.mrf.mxu1  ;;  %v1298_v23 = vpop.f32.mrf.mxu0  ;;  %v2041_v48 = vrot.slane %v3642_v15, 5  ;;  %v1856_v62 = vrot.slane %v1854_v18, 5 }
 0x121   : >> { %v3659_v38 = vadd.f32 %v662_v13, %v3438_v37  ;;  %v2073_v37 = vpack.c.b16 %v2063_v7, %v2062_v60  ;;  %v1833_v25 = vsel %vm2926_vm4, %v1828_v17, %v1832_v50  ;;  %v1843_v24 = vsel %vm2926_vm4, %v1838_v56, %v1842_v27 }
 0x122   : >> { %v824_v32 = vpop.f32.mrf.mxu2  ;;  %v1394_v50 = vrot.slane %v3319_v6, 5  ;;  %v1882_v39 = vunpack.c.l.b16 %v1833_v25  ;;  %v1883_v54 = vunpack.c.l.b16 %v1843_v24  ;;  %v1847_v6 = vrot.slane %v1845_v14, 4 }
 0x123   : >> { %v852_v52 = vadd.f32 %v824_v32, %v656_v42  ;;  %2589 = vmatmul.msk.bf16.gmra.mxu3 %vm481_vm3, %v1891_v19  ;;  %v1393_v19 = vrot.slane %v1391_v8, 4  ;;  %v1850_v4 = vrot.slane %v1848_v5, 5  ;;  %v1860_v13 = vrot.slane %v1858_v29, 4  ;;  %v2541_v32 = vld [vmem:[%s2888_s23 + $0x74] sm:$0x1] }
 0x124   : >> { %v1892_v28 = vpack.c.b16 %v1883_v54, %v1882_v39  ;;  %v1864_v56 = vshll.u32 %v2541_v32, 16 }
 0x125   : >> { %v1014_v46 = vadd.f32 %v986_v11, %v852_v52  ;;  %v1395_v47 = vsel %vm3083_vm7, %v1393_v19, %v1394_v50  ;;  %v1851_v52 = vor.u32 %v1850_v4, %v1847_v6  ;;  %v1861_v17 = vor.u32 %v1860_v13, %v1856_v62 }
 0x126   : >> { %v991_v12 = vpop.f32.mrf.mxu3  ;;  %v1866_v9 = vrot.slane %v1864_v56, 5 }
 0x127   : >> { %v3674_v34 = vadd.f32 %v1296_v3, %v1014_v46  ;;  %v2506_v3 = vrot.slane %v3289_v16, 9  ;;  %v1852_v24 = vrot.slane %v1851_v52, 4 }
 0x128   : >> { %v3676_v11 = vpop.f32.mrf.mxu1  ;;  %v1301_v53 = vpop.f32.mrf.mxu0 }
 0x129   : >> { %v666_v33 = vadd.f32 %v3676_v11, %v3324_v44  ;;  %v2635_v11 = vld [vmem:[%s2888_s23 + $0x6c] sm:$0xff] }
 0x12a   : >> { %v826_v21 = vpop.f32.mrf.mxu2 }
 0x12b   : >> { %v853_v61 = vadd.f32 %v826_v21, %v3608_v2  ;;  %2514 = vmatmul.msk.bf16.gmra.mxu1 %vm481_vm3, %v1420_v40  ;;  %2606 = vmatmul.msk.bf16.gmra.mxu0 %vm481_vm3, %v2073_v37  ;;  %v1392_v2 = vsel %vm3083_vm7, %v2506_v3, %v1391_v8  ;;  %v1413_v37 = vunpack.c.l.b16 %v1395_v47  ;;  %v2064_v8 = vunpack.c.l.b16 %v2039_v43 }
 0x12c   : >> { %v1412_v46 = vunpack.c.l.b16 %v1392_v2  ;;  %v2045_v3 = vrot.slane %v3666_v58, 5 }
 0x12d   : >> { %v1015_v42 = vadd.f32 %v988_v51, %v853_v61  ;;  %v2042_v51 = vsel %vm3083_vm7, %v2040_v63, %v2041_v48  ;;  %v2048_v48 = vrot.slane %v2541_v32, 5 }
 0x12e   : >> { %v993_v16 = vpop.f32.mrf.mxu3  ;;  %v2065_v25 = vunpack.c.l.b16 %v2042_v51  ;;  %v1421_v18 = vpack.c.b16 %v1413_v37, %v1412_v46  ;;  %v2047_v63 = vrot.slane %v2045_v3, 4  ;;  %v2046_v13 = vsel %vm3083_vm7, %v2599_v0, %v2045_v3 }
 0x12f   : >> { %2580 = vmatmul.msk.bf16.gmra.mxu2 %vm481_vm3, %v2633_v35  ;;  %v3698_v15 = vadd.f32 %v1298_v23, %v1015_v42  ;;  %v1862_v23 = vrot.slane %v1861_v17, 4 }
 0x130   : >> { %v667_v60 = vpop.f32.mrf.mxu1  ;;  %v1303_v7 = vpop.f32.mrf.mxu0  ;;  %v2074_v29 = vpack.c.b16 %v2065_v25, %v2064_v8  ;;  %v2049_v42 = vsel %vm3083_vm7, %v2047_v63, %v2048_v48 }
 0x131   : >> { %v1867_v54 = vsel %vm2926_vm4, %v1862_v23, %v1866_v9  ;;  %v2067_v2 = vunpack.c.l.b16 %v2049_v42  ;;  %v668_v31 = vadd.f32 %v667_v60, %v3345_v59 }
 0x132   : >> { %v829_v27 = vpop.f32.mrf.mxu2  ;;  %v1885_v35 = vunpack.c.l.b16 %v1867_v54 }
 0x133   : >> { %v854_v40 = vadd.f32 %v829_v27, %v3632_v10  ;;  %2590 = vmatmul.msk.bf16.gmra.mxu3 %vm481_vm3, %v1892_v28  ;;  %v1857_v10 = vsel %vm2926_vm4, %v1852_v24, %v1856_v62  ;;  %v2066_v28 = vunpack.c.l.b16 %v2046_v13 }
 0x135   : >> { %v1016_v14 = vadd.f32 %v991_v12, %v854_v40  ;;  %v2634_v12 = vld [vmem:[%s2888_s23 + $0x60] sm:$0xff] }
 0x136   : >> { %v996_v5 = vpop.f32.mrf.mxu3 }
 0x137   : >> { %v3704_v50 = vadd.f32 %v1301_v53, %v1016_v14  ;;  %v1884_v53 = vunpack.c.l.b16 %v1857_v10 }
 0x138   : >> { %v670_v21 = vpop.f32.mrf.mxu1  ;;  %v1306_v39 = vpop.f32.mrf.mxu0 }
 0x139   : >> { %v1893_v30 = vpack.c.b16 %v1885_v35, %v1884_v53  ;;  %v671_v24 = vadd.f32 %v670_v21, %v3377_v57 }
 0x13a   : >> { %v831_v19 = vpop.f32.mrf.mxu2 }
 0x13b   : >> { %v855_v61 = vadd.f32 %v831_v19, %v3659_v38  ;;  %2515 = vmatmul.msk.bf16.gmra.mxu1 %vm481_vm3, %v1421_v18  ;;  %2607 = vmatmul.msk.bf16.gmra.mxu0 %vm481_vm3, %v2074_v29 }
 0x13d   : >> { %v1017_v6 = vadd.f32 %v993_v16, %v855_v61 }
 0x13e   : >> { %v998_v4 = vpop.f32.mrf.mxu3 }
 0x13f   : >> { %2581 = vmatmul.msk.bf16.gmra.mxu2 %vm481_vm3, %v2634_v12  ;;  %v3717_v58 = vadd.f32 %v1303_v7, %v1017_v6  ;;  %v2075_v7 = vpack.c.b16 %v2067_v2, %v2066_v28 }
 0x140   : >> { %v672_v62 = vpop.f32.mrf.mxu1  ;;  %v1308_v38 = vpop.f32.mrf.mxu0 }
 0x141   : >> { %v673_v29 = vadd.f32 %v672_v62, %v3406_v49 }
 0x142   : >> { %v834_v32 = vpop.f32.mrf.mxu2 }
 0x143   : >> { %v856_v16 = vadd.f32 %v834_v32, %v666_v33  ;;  %2591 = vmatmul.msk.bf16.gmra.mxu3 %vm481_vm3, %v1893_v30 }
 0x145   : >> { %v1018_v47 = vadd.f32 %v996_v5, %v856_v16 }
 0x146   : >> { %v1001_v43 = vpop.f32.mrf.mxu3 }
 0x147   : >> { %v3726_v51 = vadd.f32 %v1306_v39, %v1018_v47 }
 0x148   : >> { %v1458_v52 = vpop.f32.mrf.mxu1  ;;  %v1311_v17 = vpop.f32.mrf.mxu0 }
 0x149   : >> { %v1498_v56 = vadd.f32 %v1458_v52, %v3475_v45 }
 0x14a   : >> { %v836_v27 = vpop.f32.mrf.mxu2 }
 0x14b   : >> { %v857_v44 = vadd.f32 %v836_v27, %v668_v31  ;;  %2608 = vmatmul.msk.bf16.gmra.mxu0 %vm481_vm3, %v2075_v7 }
 0x14d   : >> { %v1019_v46 = vadd.f32 %v998_v4, %v857_v44 }
 0x14e   : >> { %v1003_v40 = vpop.f32.mrf.mxu3 }
 0x14f   : >> { %2582 = vmatmul.msk.bf16.gmra.mxu2 %vm481_vm3, %v2635_v11  ;;  %v3733_v37 = vadd.f32 %v1308_v38, %v1019_v46 }
 0x150   : >> { %v1460_v8 = vpop.f32.mrf.mxu1  ;;  %v1313_v25 = vpop.f32.mrf.mxu0 }
 0x151   : >> { %v1499_v23 = vadd.f32 %v1460_v8, %v3502_v36 }
 0x152   : >> { %v839_v59 = vpop.f32.mrf.mxu2 }
 0x153   : >> { %v858_v60 = vadd.f32 %v839_v59, %v671_v24 }
 0x155   : >> { %v1020_v45 = vadd.f32 %v1001_v43, %v858_v60 }
 0x156   : >> { %v1930_v9 = vpop.f32.mrf.mxu3 }
 0x157   : >> { %v3737_v14 = vadd.f32 %v1311_v17, %v1020_v45 }
 0x158   : >> { %v1463_v5 = vpop.f32.mrf.mxu1  ;;  %v2112_v18 = vpop.f32.mrf.mxu0 }
 0x159   : >> { %v1500_v39 = vadd.f32 %v1463_v5, %v3522_v20 }
 0x15a   : >> { %v841_v10 = vpop.f32.mrf.mxu2 }
 0x15b   : >> { %v859_v54 = vadd.f32 %v841_v10, %v673_v29 }
 0x15d   : >> { %v1021_v3 = vadd.f32 %v1003_v40, %v859_v54 }
 0x15e   : >> { %v1932_v19 = vpop.f32.mrf.mxu3 }
 0x15f   : >> { %v3741_v61 = vadd.f32 %v1313_v25, %v1021_v3 }
 0x160   : >> { %v1465_v57 = vpop.f32.mrf.mxu1  ;;  %v2114_v36 = vpop.f32.mrf.mxu0 }
 0x161   : >> { %v1501_v21 = vadd.f32 %v1465_v57, %v3550_v1 }
 0x162   : >> { %v1620_v12 = vpop.f32.mrf.mxu2 }
 0x163   : >> { %v1660_v53 = vadd.f32 %v1620_v12, %v1498_v56 }
 0x165   : >> { %v1970_v35 = vadd.f32 %v1930_v9, %v1660_v53 }
 0x166   : >> { %v1935_v0 = vpop.f32.mrf.mxu3 }
 0x167   : >> { %v3744_v63 = vadd.f32 %v2112_v18, %v1970_v35 }
 0x168   : >> { %v1468_v48 = vpop.f32.mrf.mxu1  ;;  %v2117_v49 = vpop.f32.mrf.mxu0 }
 0x169   : >> { %v1502_v20 = vadd.f32 %v1468_v48, %v3580_v55 }
 0x16a   : >> { %v1622_v6 = vpop.f32.mrf.mxu2 }
 0x16b   : >> { %v1661_v4 = vadd.f32 %v1622_v6, %v1499_v23 }
 0x16d   : >> { %v1971_v30 = vadd.f32 %v1932_v19, %v1661_v4 }
 0x16e   : >> { %v1937_v62 = vpop.f32.mrf.mxu3 }
 0x16f   : >> { %v3747_v38 = vadd.f32 %v2114_v36, %v1971_v30 }
 0x170   : >> { %v1470_v13 = vpop.f32.mrf.mxu1  ;;  %v2119_v42 = vpop.f32.mrf.mxu0 }
 0x171   : >> { %v1503_v1 = vadd.f32 %v1470_v13, %v3605_v41 }
 0x172   : >> { %v1625_v33 = vpop.f32.mrf.mxu2 }
 0x173   : >> { %v1662_v32 = vadd.f32 %v1625_v33, %v1500_v39 }
 0x175   : >> { %v1972_v16 = vadd.f32 %v1935_v0, %v1662_v32 }
 0x176   : >> { %v1940_v28 = vpop.f32.mrf.mxu3 }
 0x177   : >> { %v3750_v2 = vadd.f32 %v2117_v49, %v1972_v16 }
 0x178   : >> { %v1473_v47 = vpop.f32.mrf.mxu1  ;;  %v2122_v43 = vpop.f32.mrf.mxu0 }
 0x179   : >> { %v1504_v55 = vadd.f32 %v1473_v47, %v3628_v22 }
 0x17a   : >> { %v1627_v7 = vpop.f32.mrf.mxu2 }
 0x17b   : >> { %v1663_v52 = vadd.f32 %v1627_v7, %v1501_v21 }
 0x17d   : >> { %v1973_v17 = vadd.f32 %v1937_v62, %v1663_v52 }
 0x17e   : >> { %v1942_v31 = vpop.f32.mrf.mxu3 }
 0x17f   : >> { %v3753_v56 = vadd.f32 %v2119_v42, %v1973_v17 }
 0x180   : >> { %v1475_v27 = vpop.f32.mrf.mxu1  ;;  %v2124_v44 = vpop.f32.mrf.mxu0 }
 0x181   : >> { %v1505_v41 = vadd.f32 %v1475_v27, %v3654_v26 }
 0x182   : >> { %v1630_v11 = vpop.f32.mrf.mxu2 }
 0x183   : >> { %v1664_v46 = vadd.f32 %v1630_v11, %v1502_v20 }
 0x185   : >> { %v1974_v40 = vadd.f32 %v1940_v28, %v1664_v46 }
 0x186   : >> { %v1945_v8 = vpop.f32.mrf.mxu3 }
 0x187   : >> { %v3756_v25 = vadd.f32 %v2122_v43, %v1974_v40 }
 0x188   : >> { %v1478_v24 = vpop.f32.mrf.mxu1  ;;  %v2127_v23 = vpop.f32.mrf.mxu0 }
 0x189   : >> { %v1506_v22 = vadd.f32 %v1478_v24, %v3674_v34 }
 0x18a   : >> { %v1632_v59 = vpop.f32.mrf.mxu2 }
 0x18b   : >> { %v1665_v60 = vadd.f32 %v1632_v59, %v1503_v1 }
 0x18d   : >> { %v1975_v45 = vadd.f32 %v1942_v31, %v1665_v60 }
 0x18e   : >> { %v1947_v9 = vpop.f32.mrf.mxu3 }
 0x18f   : >> { %v3759_v5 = vadd.f32 %v2124_v44, %v1975_v45 }
 0x190   : >> { %v2129_v18 = vpop.f32.mrf.mxu0  ;;  %v1480_v19 = vpop.f32.mrf.mxu1 }
 0x192   : >> { %v1635_v29 = vpop.f32.mrf.mxu2 }
 0x193   : >> { %v1666_v39 = vadd.f32 %v1635_v29, %v1504_v55 }
 0x195   : >> { %v1976_v26 = vadd.f32 %v1945_v8, %v1666_v39  ;;  %v1507_v39 = vadd.f32 %v1480_v19, %v3698_v15 }
 0x196   : >> { %v1950_v10 = vpop.f32.mrf.mxu3 }
 0x197   : >> { %v3761_v54 = vadd.f32 %v2127_v23, %v1976_v26 }
 0x198   : >> { %v2132_v3 = vpop.f32.mrf.mxu0  ;;  %v1483_v48 = vpop.f32.mrf.mxu1 }
 0x19a   : >> { %v1637_v57 = vpop.f32.mrf.mxu2 }
 0x19b   : >> { %v1667_v36 = vadd.f32 %v1637_v57, %v1505_v41 }
 0x19d   : >> { %v1977_v21 = vadd.f32 %v1947_v9, %v1667_v36  ;;  %v1508_v9 = vadd.f32 %v1483_v48, %v3704_v50  ;;  %v3893_v36 = vld [vmem:[#allocation5_spill] sm:$0xff] }
 0x19e   : >> { %v1952_v34 = vpop.f32.mrf.mxu3 }
 0x19f   : >> { %v3763_v12 = vadd.f32 %v2129_v18, %v1977_v21 }
 0x1a0   : >> { %v3765_v35 = vpop.f32.mrf.mxu0  ;;  %v1485_v62 = vpop.f32.mrf.mxu1 }
 0x1a1   : >> { %v1509_v23 = vadd.f32 %v1485_v62, %v3717_v58  ;;  %v2169_v58 = vperm.slane %v3893_v36, 0 }
 0x1a2   : >> { %v1640_v53 = vpop.f32.mrf.mxu2 }
 0x1a3   : >> { %v1668_v0 = vadd.f32 %v1640_v53, %v1506_v22 }
 0x1a5   : >> { %v1978_v49 = vadd.f32 %v1950_v10, %v1668_v0 }
 0x1a6   : >> { %v1955_v4 = vpop.f32.mrf.mxu3 }
 0x1a7   : >> { %v3767_v20 = vadd.f32 %v2132_v3, %v1978_v49 }
 0x1a8   : >> { %v2137_v30 = vpop.f32.mrf.mxu0  ;;  %v1488_v33 = vpop.f32.mrf.mxu1 }
 0x1a9   : >> { %v1510_v8 = vadd.f32 %v1488_v33, %v3726_v51 }
 0x1aa   : >> { %v1642_v6 = vpop.f32.mrf.mxu2 }
 0x1ab   : >> { %v1669_v21 = vadd.f32 %v1642_v6, %v1507_v39  ;;  %v2231_v39 = vld [vmem:[%s3882_s3 + $0x30] sm:$0xff] (%p226_p11) }
 0x1ad   : >> { %v1979_v33 = vadd.f32 %v1952_v34, %v1669_v21 }
 0x1ae   : >> { %v1957_v42 = vpop.f32.mrf.mxu3 }
 0x1b0   : >> { %v2139_v1 = vpop.f32.mrf.mxu0  ;;  %v1490_v47 = vpop.f32.mrf.mxu1 }
 0x1b1   : >> { %v1511_v11 = vadd.f32 %v1490_v47, %v3733_v37 }
 0x1b2   : >> { %v1645_v13 = vpop.f32.mrf.mxu2 }
 0x1b3   : >> { %v1670_v26 = vadd.f32 %v1645_v13, %v1508_v9  ;;  %v2235_v9 = vld [vmem:[%s3882_s3 + $0x50] sm:$0xff] (%p226_p11) }
 0x1b5   : >> { %v1980_v49 = vadd.f32 %v1955_v4, %v1670_v26  ;;  %v2229_v26 = vld [vmem:[%s3882_s3 + $0x20] sm:$0xff] (%p226_p11) }
 0x1b6   : >> { %v1960_v16 = vpop.f32.mrf.mxu3 }
 0x1b7   : >> { %v2162_v19 = vadd.f32 %v2137_v30, %v1980_v49 }
 0x1b8   : >> { %v2142_v28 = vpop.f32.mrf.mxu0  ;;  %v1493_v17 = vpop.f32.mrf.mxu1 }
 0x1b9   : >> { %v1512_v44 = vadd.f32 %v1493_v17, %v3737_v14 }
 0x1ba   : >> { %v1647_v32 = vpop.f32.mrf.mxu2 }
 0x1bb   : >> { %v1671_v18 = vadd.f32 %v1647_v32, %v1509_v23  ;;  %v2776_v23 = vmov 1.0  }
 0x1bd   : >> { %v1981_v53 = vadd.f32 %v1957_v42, %v1671_v18  ;;  %v2234_v18 = vld [vmem:[%s3882_s3 + $0x48] sm:$0xff] (%p226_p11) }
 0x1be   : >> { %v1962_v55 = vpop.f32.mrf.mxu3 }
 0x1bf   : >> { %v2163_v32 = vadd.f32 %v2139_v1, %v1981_v53  ;;  %v2179_v1 = vadd.f32 %v2169_v58, %v3767_v20  ;;  %v2174_v20 = vadd.f32 %v2169_v58, %v3753_v56 }
 0x1c0   : >> { %v2144_v7 = vpop.f32.mrf.mxu0  ;;  %v1495_v40 = vpop.f32.mrf.mxu1 }
 0x1c1   : >> { %v1513_v59 = vadd.f32 %v1495_v40, %v3741_v61  ;;  %v2182_v6 = vadd.f32 %v2169_v58, %v2163_v32  ;;  %v2195_v17 = vmax.f32 %v2179_v1, 0.0  ;;  %v2190_v40 = vmax.f32 %v2174_v20, 0.0 }
 0x1c2   : >> { %v1650_v43 = vpop.f32.mrf.mxu2 }
 0x1c3   : >> { %v1672_v22 = vadd.f32 %v1650_v43, %v1510_v8  ;;  %v2161_v43 = vadd.f32 %v3765_v35, %v1979_v33  ;;  %v2198_v4 = vmax.f32 %v2182_v6, 0.0  ;;  %v2177_v35 = vadd.f32 %v2169_v58, %v3761_v54 }
 0x1c4   : >> { %v2172_v54 = vadd.f32 %v2169_v58, %v3747_v38  ;;  %v2239_v38 = vld [vmem:[%s3882_s3 + $0x70] sm:$0xff] (%p226_p11) }
 0x1c5   : >> { %v1982_v10 = vadd.f32 %v1960_v16, %v1672_v22  ;;  %v3894_v22 = vld [vmem:[#allocation6_spill] sm:$0xff] }
 0x1c6   : >> { %v1965_v31 = vpop.f32.mrf.mxu3 }
 0x1c7   : >> { %v2164_v62 = vadd.f32 %v2142_v28, %v1982_v10  ;;  %v2180_v28 = vadd.f32 %v2169_v58, %v2161_v43  ;;  %v2228_v10 = vld [vmem:[%s3882_s3 + $0x18] sm:$0xff] (%p226_p11) }
 0x1c8   : >> { %v2147_v41 = vpop.f32.mrf.mxu0 }
 0x1c9   : >> { %v2183_v16 = vadd.f32 %v2169_v58, %v2164_v62  ;;  %v2196_v30 = vmax.f32 %v2180_v28, 0.0 }
 0x1ca   : >> { %v1652_v52 = vpop.f32.mrf.mxu2 }
 0x1cb   : >> { %v1673_v24 = vadd.f32 %v1652_v52, %v1511_v11  ;;  %v2199_v42 = vmax.f32 %v2183_v16, 0.0  ;;  %v2178_v52 = vadd.f32 %v2169_v58, %v3763_v12  ;;  %v2173_v12 = vadd.f32 %v2169_v58, %v3750_v2  ;;  %v2238_v2 = vld [vmem:[%s3882_s3 + $0x68] sm:$0xff] (%p226_p11) }
 0x1cd   : >> { %v1983_v29 = vadd.f32 %v1962_v55, %v1673_v24  ;;  %v2189_v8 = vmax.f32 %v2173_v12, 0.0  ;;  %v2188_v24 = vmax.f32 %v2172_v54, 0.0 }
 0x1ce   : >> { %v1967_v37 = vpop.f32.mrf.mxu3 }
 0x1cf   : >> { %v2165_v61 = vadd.f32 %v2144_v7, %v1983_v29  ;;  %v2181_v7 = vadd.f32 %v2169_v58, %v2162_v19  ;;  %v2233_v29 = vld [vmem:[%s3882_s3 + $0x40] sm:$0xff] (%p226_p11) }
 0x1d0   : >> { %v2149_v57 = vpop.f32.mrf.mxu0 }
 0x1d1   : >> { %v2184_v15 = vadd.f32 %v2169_v58, %v2165_v61  ;;  %v2197_v34 = vmax.f32 %v2181_v7, 0.0 }
 0x1d2   : >> { %v1655_v27 = vpop.f32.mrf.mxu2 }
 0x1d3   : >> { %v1674_v46 = vadd.f32 %v1655_v27, %v1512_v44  ;;  %v2200_v55 = vmax.f32 %v2184_v15, 0.0  ;;  %v2176_v27 = vadd.f32 %v2169_v58, %v3759_v5  ;;  %v2193_v44 = vmax.f32 %v2177_v35, 0.0 }
 0x1d4   : >> { %v2171_v5 = vadd.f32 %v2169_v58, %v3744_v63  ;;  %v2240_v63 = vld [vmem:[%s3882_s3 + $0x78] sm:$0xff] (%p226_p11) }
 0x1d5   : >> { %v1984_v60 = vadd.f32 %v1965_v31, %v1674_v46  ;;  %v2194_v31 = vmax.f32 %v2178_v52, 0.0  ;;  %v2192_v11 = vmax.f32 %v2176_v27, 0.0  ;;  %2242 = vmatpush.msra.mxu0 (%p226_p11), %v2240_v63 }
 0x1d7   : >> { %v2166_v3 = vadd.f32 %v2147_v41, %v1984_v60  ;;  %v2175_v41 = vadd.f32 %v2169_v58, %v3756_v25  ;;  %v2187_v25 = vmax.f32 %v2171_v5, 0.0  ;;  %2243 = vmatpush.msra.mxu0 (%p226_p11), %v2239_v38  ;;  %v2237_v60 = vld [vmem:[%s3882_s3 + $0x60] sm:$0xff] (%p226_p11) }
 0x1d9   : >> { %v2185_v48 = vadd.f32 %v2169_v58, %v2166_v3  ;;  %v2191_v46 = vmax.f32 %v2175_v41, 0.0  ;;  %2244 = vmatpush.msra.mxu0 (%p226_p11), %v2238_v2  ;;  %v2227_v3 = vld [vmem:[%s3882_s3 + $0x10] sm:$0xff] (%p226_p11) }
 0x1da   : >> { %v1657_v45 = vpop.f32.mrf.mxu2 }
 0x1db   : >> { %v1675_v14 = vadd.f32 %v1657_v45, %v1513_v59  ;;  %v2201_v13 = vmax.f32 %v2185_v48, 0.0  ;;  %v2236_v45 = vld [vmem:[%s3882_s3 + $0x58] sm:$0xff] (%p226_p11)  ;;  %2245 = vmatpush.msra.mxu0 (%p226_p11), %v2237_v60 }
 0x1dd   : >> { %v1985_v51 = vadd.f32 %v1967_v37, %v1675_v14  ;;  %2246 = vmatpush.msra.mxu0 (%p226_p11), %v2236_v45  ;;  %v2232_v14 = vld [vmem:[%s3882_s3 + $0x38] sm:$0xff] (%p226_p11)  ;;  %v2230_v37 = vld [vmem:[%s3882_s3 + $0x28] sm:$0xff] (%p226_p11) }
 0x1df   : >> { %v2167_v0 = vadd.f32 %v2149_v57, %v1985_v51  ;;  %2247 = vmatpush.msra.mxu0 (%p226_p11), %v2235_v9  ;;  %v2226_v51 = vld [vmem:[%s3882_s3 + $0x8] sm:$0xff] (%p226_p11)  ;;  %v2225_v57 = vld [vmem:[%s3882_s3] sm:$0xff] (%p226_p11) }
 0x1e1   : >> { %v2186_v50 = vadd.f32 %v2169_v58, %v2167_v0  ;;  %2248 = vmatpush.msra.mxu0 (%p226_p11), %v2234_v18  ;;  %v2241_v58 = vld [vmem:[%s3883_s4] sm:$0x1] (%p226_p11) }
 0x1e3   : >> { %v2202_v47 = vmax.f32 %v2186_v50, 0.0  ;;  %2249 = vmatpush.msra.mxu0 (%p226_p11), %v2233_v29 }
 0x1e5   : >> { %2203 = vmatpush.msrb.mxu1 %v2202_v47  ;;  %2250 = vmatpush.msra.mxu0 (%p226_p11), %v2232_v14 }
 0x1e7   : >> { %2204 = vmatpush.msrb.mxu1 %v2201_v13  ;;  %2251 = vmatpush.msra.mxu0 (%p226_p11), %v2231_v39 }
 0x1e9   : >> { %2205 = vmatpush.msrb.mxu1 %v2200_v55  ;;  %2252 = vmatpush.msra.mxu0 (%p226_p11), %v2230_v37 }
 0x1eb   : >> { %2206 = vmatpush.msrb.mxu1 %v2199_v42  ;;  %2253 = vmatpush.msra.mxu0 (%p226_p11), %v2229_v26 }
 0x1ed   : >> { %2207 = vmatpush.msrb.mxu1 %v2198_v4  ;;  %2254 = vmatpush.msra.mxu0 (%p226_p11), %v2228_v10 }
 0x1ef   : >> { %2208 = vmatpush.msrb.mxu1 %v2197_v34  ;;  %2255 = vmatpush.msra.mxu0 (%p226_p11), %v2227_v3 }
 0x1f1   : >> { %2209 = vmatpush.msrb.mxu1 %v2196_v30  ;;  %2256 = vmatpush.msra.mxu0 (%p226_p11), %v2226_v51 }
 0x1f3   : >> { %2210 = vmatpush.msrb.mxu1 %v2195_v17  ;;  %2257 = vmatpush.msra.mxu0 (%p226_p11), %v2225_v57 }
 0x1f5   : >> { %2211 = vmatpush.msrb.mxu1 %v2194_v31 }
 0x1f7   : >> { %2212 = vmatpush.msrb.mxu1 %v2193_v44 }
 0x1f9   : >> { %2213 = vmatpush.msrb.mxu1 %v2192_v11 }
 0x1fb   : >> { %2214 = vmatpush.msrb.mxu1 %v2191_v46 }
 0x1fd   : >> { %2215 = vmatpush.msrb.mxu1 %v2190_v40 }
 0x1ff   : >> { %2216 = vmatpush.msrb.mxu1 %v2189_v8 }
 0x201   : >> { %2217 = vmatpush.msrb.mxu1 %v2188_v24 }
 0x203   : >> { %2218 = vmatpush.msrb.mxu1 %v2187_v25 }
 0x204   : >> { %2219 = vmatmul.f32.vlgmr.msrb.gmra.mxu1 %v2776_v23 }
 0x280   : > { %228 = sbr.rel (!%p226_p11) target bundleno = 26 (0x1a), region = 93 }
 0x281   : >> { %v2220_v56 = vpop.f32.mrf.mxu1 }
 0x282   : >> { %v2223_v59 = vadd.f32 %v3894_v22, %v2220_v56  }
 0x284   : >> { %v3895_v1 = vmov %v2223_v59  ;;  %v2224_v36 = vmul.f32 (%p226_p11), 0.00390625, %v2223_v59 }
 0x286   : > { %2258 = vmatmul.f32.vlgmr.msra.gmra.mxu0 %v2224_v36 }
 0x303   : > { %v2259_v21 = vpop.f32.mrf.mxu0 }
 0x304   : > { %v2260_v53 = vadd.f32 %v2259_v21, %v2241_v58 }
 0x306   : > { %2262 = vst [vmem:[%s2870_s13] sm:$0x1] %v2260_v53 }
 0x307   : > { %2723 = shalt.err (!%p2720_p4)
}
 0x308   : > { %2640 = dma.vmem_to_hbm [thread:$0]  (%p2845_p5), %s2275_s12, 16, %s2277_s26, %s2264_s6  }
 0x309 PF: > { %p2646_p7 = scmp.ge.s32.totalorder %s2766_s21, 2  ;;  %s2288_s30 = sand.u32 1, %s2754_s18  }
 0x30a   : > { %s2289_s13 = scalar_lea.sflag [#allocation3], %s2288_s30 }
 0x30b   : > { %p2643_p8 = pnand %p2646_p7, %p2849_p6 }
 0x30d   : > { %p2644_p9 = pneg %p2643_p8 }
 0x30f   : > { %2749 = dma.done.wait (%p2644_p9), %s2289_s13, 16  }
 0x310   : > { %2751 = vsyncadd (%p2644_p9), %s2289_s13, 4294967280  ;;  %p15_p10 = scmp.ge.s32.totalorder %s2832_s24, 4   ;;  %s3896_s18 = smov %s2758_s19 }
 0x311   : > { %s3897_s19 = smov %s2762_s20  ;;  %s3898_s20 = smov %s2843_s27 }
 0x312   : > { %s3899_s21 = smov %s2832_s24  ;;  %17 = sbr.rel (!%p15_p10) target bundleno = 3 (0x3), region = 104 }
 0x317   :  { %2294 = vsyncpa [#allocation3], 1 }
 0x318   :  { %2296 = vsyncpa [#allocation3 + $0x1], 1 }

</bundles_post_ra>
